<compile_context>
chip_gen: v7x
topology: tpu7x:2x2x1
jax: 0.10.0
libtpu: 0.0.40
codegen_flags: <defaults>
</compile_context>

<pallas_src>
import functools

import jax
import jax.numpy as jnp
from jax import lax
from jax.experimental import pallas as pl
from jax.experimental.pallas import tpu as pltpu


def _self_attn_kernel(x_ref, w_ref, b_ref, gamma_ref, out_ref, att_ref=None, *,
                      cp, c, tq, n_qt, nb):
    """One grid step: `nb` images x one query tile of `tq` rows.

    x_ref:   (nb, C, N)   input feature maps, channel-major (C on sublanes, N on lanes)
    w_ref:   (2*cp+c, C)  fused [Wq_pad; Wk_pad; Wv] (matmul dtype)
    b_ref:   (2*cp+c, 1)  fused bias column (f32)
    gamma_ref: (1,) f32   SMEM scalar
    out_ref: (nb, C, tq)
    att_ref: (nb, tq, N)  optional attention map output
    """
    qi = pl.program_id(1)
    gamma = gamma_ref[0]
    w = w_ref[...]
    b = b_ref[...]
    dot_dtype = w.dtype

    for bi in range(nb):                     # small static unroll over the batch block
        x = x_ref[bi]                        # (C, N) f32

        # Fused QKV projection: one (2*cp+c, C) @ (C, N) MXU matmul, f32 accumulation.
        qkv = jnp.dot(w, x.astype(dot_dtype),
                      preferred_element_type=jnp.float32) + b          # (2*cp+c, N)
        q_all = qkv[:cp]                     # (cp, N)  zero-padded query channels
        k = qkv[cp:2 * cp]                   # (cp, N)
        v = qkv[2 * cp:2 * cp + c]           # (C,  N)

        if n_qt == 1:                        # whole feature map in one query tile
            q_t = q_all                      # (cp, tq == N)
            x_t = x                          # (C,  tq == N)
        else:                                # query-row tiling for large N
            start = pl.multiple_of(qi * tq, tq)
            q_t = lax.dynamic_slice_in_dim(q_all, start, tq, axis=1)
            x_t = lax.dynamic_slice_in_dim(x, start, tq, axis=1)

        # energy[i, j] = <q[:, i], k[:, j]>  -> (tq, N); contraction over cp (128-aligned),
        # no explicit transpose materialized.
        energy = lax.dot_general(q_t.astype(dot_dtype), k.astype(dot_dtype),
                                 (((0,), (0,)), ((), ())),
                                 preferred_element_type=jnp.float32)

        # Numerically stable softmax over keys (last axis), all stats in f32.
        m = jnp.max(energy, axis=-1, keepdims=True)
        e = jnp.exp(energy - m)
        l = jnp.sum(e, axis=-1, keepdims=True)
        inv = pl.reciprocal(l, approx=True)          # EUP seed ...
        inv = inv * (2.0 - l * inv)                  # ... + one Newton step -> f32 accurate
        att = e * inv                                # (tq, N)

        # out[c, i] = sum_j v[c, j] * att[i, j]  -> (C, tq)
        out_ct = lax.dot_general(v.astype(dot_dtype), att.astype(dot_dtype),
                                 (((1,), (1,)), ((), ())),
                                 preferred_element_type=jnp.float32)

        out_ref[bi] = (gamma * out_ct + x_t).astype(out_ref.dtype)
        if att_ref is not None:
            att_ref[bi] = att.astype(att_ref.dtype)


def self_attn_forward(x_nchw, wq, bq, wk, bk, wv, bv, gamma, *,
                      matmul_dtype=jnp.float32, return_attention=True):
    """Self_Attn forward.

    x_nchw: (B, C, W, H) f32.  wq/wk: (C//8, C), wv: (C, C)  (Conv2d 1x1 weights in
    (out_ch, in_ch) layout).  Returns (out (B,C,W,H), attention (B,N,N)) or just out.
    """
    B, C, W, H = x_nchw.shape
    N = W * H
    C8 = wq.shape[0]
    assert wq.shape == (C8, C) and wk.shape == (C8, C) and wv.shape == (C, C)

    # (B, C, W, H) -> (B, C, N): free reshape, no transpose (matches torch .view).
    x_flat = x_nchw.reshape(B, C, N).astype(jnp.float32)

    # Pad query/key channels up to a multiple of 128 (zero rows/biases are exact).
    Cp = ((C8 + 127) // 128) * 128
    pad_w = lambda w: jnp.pad(w, ((0, Cp - w.shape[0]), (0, 0)))
    pad_b = lambda v: jnp.pad(v, (0, Cp - v.shape[0]))
    w_fused = jnp.concatenate([pad_w(wq), pad_w(wk), wv], axis=0).astype(matmul_dtype)
    b_fused = jnp.concatenate([pad_b(bq), pad_b(bk), bv], axis=0
                              ).astype(jnp.float32).reshape(2 * Cp + C, 1)
    gamma_s = jnp.asarray(gamma, jnp.float32).reshape(1)

    # Tiling: fold small batches into one grid step; tile query rows for large N.
    nb = B if (N <= 128 and B <= 8) else 1
    tq = N
    for t in (256, 128):                     # conservative cap (fits v7x 64 MiB VMEM)
        if N > t and N % t == 0:
            tq = t
            break
    n_qt = N // tq
    grid = (B // nb, n_qt)

    kernel = functools.partial(_self_attn_kernel, cp=Cp, c=C, tq=tq, n_qt=n_qt, nb=nb)

    out_shapes = [jax.ShapeDtypeStruct((B, C, N), jnp.float32)]
    out_specs = [pl.BlockSpec((nb, C, tq), lambda bb, qi: (bb, 0, qi))]
    if return_attention:
        out_shapes.append(jax.ShapeDtypeStruct((B, N, N), jnp.float32))
        out_specs.append(pl.BlockSpec((nb, tq, N), lambda bb, qi: (bb, qi, 0)))

    # Only raise the scoped VMEM limit when blocks are actually big (kept < v7x 64 MiB).
    est = 4 * (2 * nb * (C * N + C * tq + tq * N)
               + (2 * Cp + C) * (C + 1 + N) + 4 * tq * N)
    vmem_limit = None if est < (16 << 20) else min(2 * est, 60 << 20)

    results = pl.pallas_call(
        kernel,
        out_shape=out_shapes,
        grid_spec=pltpu.PrefetchScalarGridSpec(
            num_scalar_prefetch=0,
            grid=grid,
            in_specs=[
                pl.BlockSpec((nb, C, N), lambda bb, qi: (bb, 0, 0)),    # x (C,N per image)
                pl.BlockSpec((2 * Cp + C, C), lambda bb, qi: (0, 0)),   # fused Wq|Wk|Wv
                pl.BlockSpec((2 * Cp + C, 1), lambda bb, qi: (0, 0)),   # fused bias column
                pl.BlockSpec(memory_space=pltpu.MemorySpace.SMEM),      # gamma scalar
            ],
            out_specs=out_specs,
        ),
        compiler_params=pltpu.CompilerParams(
            dimension_semantics=("parallel", "parallel"),
            vmem_limit_bytes=vmem_limit),
    )(x_flat, w_fused, b_fused, gamma_s)

    out = results[0].reshape(B, C, W, H)     # free reshape, already NCHW order
    if return_attention:
        return out, results[1]
    return out


def _reference(x_nchw, wq, bq, wk, bk, wv, bv, gamma):
    B, C, W, H = x_nchw.shape
    N = W * H
    hp = lax.Precision.HIGHEST
    xf = x_nchw.reshape(B, C, N)
    q = jnp.einsum('oc,bcn->bon', wq, xf, precision=hp) + bq[None, :, None]
    k = jnp.einsum('oc,bcn->bon', wk, xf, precision=hp) + bk[None, :, None]
    v = jnp.einsum('oc,bcn->bon', wv, xf, precision=hp) + bv[None, :, None]
    energy = jnp.einsum('bci,bcj->bij', q, k, precision=hp)
    att = jax.nn.softmax(energy, axis=-1)
    out = jnp.einsum('bcj,bij->bci', v, att, precision=hp)
    out = gamma * out + xf
    return out.reshape(B, C, W, H), att


if __name__ == "__main__":
    B, C, W, H = 2, 16, 8, 8                 # in_dim = 16 -> query/key channels = 2
    C8 = C // 8
    key = jax.random.PRNGKey(0)
    kx, kwq, kwk, kwv, kbq, kbk, kbv = jax.random.split(key, 7)

    x = jax.random.normal(kx, (B, C, W, H), jnp.float32)
    # 1x1 Conv2d weights in (out_ch, in_ch) layout (== weight[:, :, 0, 0]); per-out biases.
    wq = 0.1 * jax.random.normal(kwq, (C8, C), jnp.float32)
    wk = 0.1 * jax.random.normal(kwk, (C8, C), jnp.float32)
    wv = 0.1 * jax.random.normal(kwv, (C, C), jnp.float32)
    bq = 0.1 * jax.random.normal(kbq, (C8,), jnp.float32)
    bk = 0.1 * jax.random.normal(kbk, (C8,), jnp.float32)
    bv = 0.1 * jax.random.normal(kbv, (C,), jnp.float32)
    # Module init is gamma=0 (out == x); use a nonzero gamma so the attention path
    # actually contributes to the checked output.
    gamma = jnp.float32(0.7)

    out, att = self_attn_forward(x, wq, bq, wk, bk, wv, bv, gamma)
    out = jax.block_until_ready(out)
    att = jax.block_until_ready(att)

    ref_out, ref_att = _reference(x, wq, bq, wk, bk, wv, bv, gamma)
    assert out.shape == (B, C, W, H) and att.shape == (B, W * H, W * H)
    assert jnp.allclose(out, ref_out, atol=1e-4, rtol=1e-4)
    assert jnp.allclose(att, ref_att, atol=1e-4, rtol=1e-4)

    # bf16 MXU-input path (v6e/v7x throughput), f32 accumulation + f32 softmax stats.
    out_bf, att_bf = self_attn_forward(x, wq, bq, wk, bk, wv, bv, gamma,
                                       matmul_dtype=jnp.bfloat16)
    out_bf = jax.block_until_ready(out_bf)
    assert jnp.allclose(out_bf, ref_out, atol=3e-2, rtol=3e-2)
    assert jnp.allclose(att_bf, ref_att, atol=3e-2, rtol=3e-2)

    # Attention-map output disabled (skips the O(N^2) HBM writeback).
    out_only = self_attn_forward(x, wq, bq, wk, bk, wv, bv, gamma,
                                 return_attention=False)
    out_only = jax.block_until_ready(out_only)
    assert jnp.allclose(out_only, ref_out, atol=1e-4, rtol=1e-4)

    print("KERNEL_OK")
</pallas_src>

<mosaic_0001>
module attributes {stable_mosaic.version = 11 : i64} {
  func.func @_self_attn_kernel(%arg0: i32, %arg1: i32, %arg2: memref<2x16x64xf32, #tpu.memory_space<vmem>>, %arg3: memref<272x16xf32, #tpu.memory_space<vmem>>, %arg4: memref<272x1xf32, #tpu.memory_space<vmem>>, %arg5: memref<1xf32, #tpu.memory_space<smem>>, %arg6: memref<2x16x64xf32, #tpu.memory_space<vmem>>, %arg7: memref<2x64x64xf32, #tpu.memory_space<vmem>>) attributes {dimension_semantics = [#tpu.dimension_semantics<parallel>, #tpu.dimension_semantics<parallel>], iteration_bounds = array<i64: 1, 1>, scalar_prefetch = 0 : i64, scratch_operands = 0 : i64, tpu.core_type = #tpu.core_type<tc>, window_params = [{transform_indices = @transform_0, window_bounds = array<i64: 2, 16, 64>}, {pipeline_mode = #tpu.pipeline_mode<synchronous>, transform_indices = @transform_1, window_bounds = array<i64: 272, 16>}, {pipeline_mode = #tpu.pipeline_mode<synchronous>, transform_indices = @transform_2, window_bounds = array<i64: 272, 1>}, {transform_indices = @transform_3, window_bounds = array<i64: 1>}, {transform_indices = @transform_4, window_bounds = array<i64: 2, 16, 64>}, {transform_indices = @transform_5, window_bounds = array<i64: 2, 64, 64>}]} {
    %c0 = arith.constant 0 : index
    %0 = memref.load %arg5[%c0] : memref<1xf32, #tpu.memory_space<smem>>
    %c0_0 = arith.constant 0 : index
    %c0_1 = arith.constant 0 : index
    %1 = vector.load %arg3[%c0_0, %c0_1] : memref<272x16xf32, #tpu.memory_space<vmem>>, vector<272x16xf32>
    %c0_2 = arith.constant 0 : index
    %c0_3 = arith.constant 0 : index
    %2 = vector.load %arg4[%c0_2, %c0_3] : memref<272x1xf32, #tpu.memory_space<vmem>>, vector<272x1xf32>
    %c0_4 = arith.constant 0 : index
    %c0_5 = arith.constant 0 : index
    %c0_6 = arith.constant 0 : index
    %3 = vector.load %arg2[%c0_4, %c0_5, %c0_6] : memref<2x16x64xf32, #tpu.memory_space<vmem>>, vector<1x16x64xf32>
    %4 = vector.shape_cast %3 : vector<1x16x64xf32> to vector<16x64xf32>
    %cst = arith.constant dense<0.000000e+00> : vector<272x64xf32>
    %5 = tpu.matmul %1, %4, %cst {dimension_numbers = #tpu.dot_dimension_numbers<[1], [0], [0], [1], [0, 0, 1, 1], [], []>} : vector<272x16xf32>, vector<16x64xf32>, vector<272x64xf32> -> vector<272x64xf32>
    %6 = vector.broadcast %2 : vector<272x1xf32> to vector<272x64xf32>
    %7 = arith.addf %5, %6 : vector<272x64xf32>
    %8 = vector.extract_strided_slice %7 {offsets = [0, 0], sizes = [128, 64], strides = [1, 1]} : vector<272x64xf32> to vector<128x64xf32>
    %9 = vector.extract_strided_slice %7 {offsets = [128, 0], sizes = [128, 64], strides = [1, 1]} : vector<272x64xf32> to vector<128x64xf32>
    %10 = vector.extract_strided_slice %7 {offsets = [256, 0], sizes = [16, 64], strides = [1, 1]} : vector<272x64xf32> to vector<16x64xf32>
    %cst_7 = arith.constant dense<0.000000e+00> : vector<64x64xf32>
    %11 = tpu.matmul %8, %9, %cst_7 {dimension_numbers = #tpu.dot_dimension_numbers<[0], [0], [1], [1], [0, 1, 1, 1], [], []>} : vector<128x64xf32>, vector<128x64xf32>, vector<64x64xf32> -> vector<64x64xf32>
    %cst_8 = arith.constant dense<0xFF800000> : vector<64xf32>
    %12 = vector.multi_reduction <maximumf>, %11, %cst_8 [1] : vector<64x64xf32> to vector<64xf32>
    %13 = vector.shape_cast %12 : vector<64xf32> to vector<64x1xf32>
    %14 = vector.broadcast %13 : vector<64x1xf32> to vector<64x64xf32>
    %15 = arith.subf %11, %14 : vector<64x64xf32>
    %16 = math.exp %15 : vector<64x64xf32>
    %cst_9 = arith.constant dense<0.000000e+00> : vector<64xf32>
    %17 = vector.multi_reduction <add>, %16, %cst_9 [1] : vector<64x64xf32> to vector<64xf32>
    %18 = vector.shape_cast %17 : vector<64xf32> to vector<64x1xf32>
    %19 = tpu.reciprocal %18 {approx = true} : vector<64x1xf32> -> vector<64x1xf32>
    %20 = arith.mulf %18, %19 : vector<64x1xf32>
    %cst_10 = arith.constant 2.000000e+00 : f32
    %21 = vector.broadcast %cst_10 : f32 to vector<64x1xf32>
    %22 = arith.subf %21, %20 : vector<64x1xf32>
    %23 = arith.mulf %19, %22 : vector<64x1xf32>
    %24 = vector.broadcast %23 : vector<64x1xf32> to vector<64x64xf32>
    %25 = arith.mulf %16, %24 : vector<64x64xf32>
    %cst_11 = arith.constant dense<0.000000e+00> : vector<16x64xf32>
    %26 = tpu.matmul %10, %25, %cst_11 {dimension_numbers = #tpu.dot_dimension_numbers<[1], [1], [0], [0], [0, 0, 1, 0], [], []>} : vector<16x64xf32>, vector<64x64xf32>, vector<16x64xf32> -> vector<16x64xf32>
    %27 = vector.broadcast %0 : f32 to vector<16x64xf32>
    %28 = arith.mulf %27, %26 : vector<16x64xf32>
    %29 = arith.addf %28, %4 : vector<16x64xf32>
    %c0_12 = arith.constant 0 : index
    %c0_13 = arith.constant 0 : index
    %c0_14 = arith.constant 0 : index
    %30 = vector.load %arg6[%c0_12, %c0_13, %c0_14] : memref<2x16x64xf32, #tpu.memory_space<vmem>>, vector<1x16x64xf32>
    %31 = vector.shape_cast %30 : vector<1x16x64xf32> to vector<16x64xf32>
    %32 = vector.shape_cast %29 : vector<16x64xf32> to vector<1x16x64xf32>
    tpu.vector_store %arg6[%c0_12, %c0_13, %c0_14], %32 {strides = array<i32>} : memref<2x16x64xf32, #tpu.memory_space<vmem>>, vector<1x16x64xf32>,
    %c0_15 = arith.constant 0 : index
    %c0_16 = arith.constant 0 : index
    %c0_17 = arith.constant 0 : index
    %33 = vector.load %arg7[%c0_15, %c0_16, %c0_17] : memref<2x64x64xf32, #tpu.memory_space<vmem>>, vector<1x64x64xf32>
    %34 = vector.shape_cast %33 : vector<1x64x64xf32> to vector<64x64xf32>
    %35 = vector.shape_cast %25 : vector<64x64xf32> to vector<1x64x64xf32>
    tpu.vector_store %arg7[%c0_15, %c0_16, %c0_17], %35 {strides = array<i32>} : memref<2x64x64xf32, #tpu.memory_space<vmem>>, vector<1x64x64xf32>,
    %c1 = arith.constant 1 : index
    %c0_18 = arith.constant 0 : index
    %c0_19 = arith.constant 0 : index
    %36 = vector.load %arg2[%c1, %c0_18, %c0_19] : memref<2x16x64xf32, #tpu.memory_space<vmem>>, vector<1x16x64xf32>
    %37 = vector.shape_cast %36 : vector<1x16x64xf32> to vector<16x64xf32>
    %cst_20 = arith.constant dense<0.000000e+00> : vector<272x64xf32>
    %38 = tpu.matmul %1, %37, %cst_20 {dimension_numbers = #tpu.dot_dimension_numbers<[1], [0], [0], [1], [0, 0, 1, 1], [], []>} : vector<272x16xf32>, vector<16x64xf32>, vector<272x64xf32> -> vector<272x64xf32>
    %39 = vector.broadcast %2 : vector<272x1xf32> to vector<272x64xf32>
    %40 = arith.addf %38, %39 : vector<272x64xf32>
    %41 = vector.extract_strided_slice %40 {offsets = [0, 0], sizes = [128, 64], strides = [1, 1]} : vector<272x64xf32> to vector<128x64xf32>
    %42 = vector.extract_strided_slice %40 {offsets = [128, 0], sizes = [128, 64], strides = [1, 1]} : vector<272x64xf32> to vector<128x64xf32>
    %43 = vector.extract_strided_slice %40 {offsets = [256, 0], sizes = [16, 64], strides = [1, 1]} : vector<272x64xf32> to vector<16x64xf32>
    %cst_21 = arith.constant dense<0.000000e+00> : vector<64x64xf32>
    %44 = tpu.matmul %41, %42, %cst_21 {dimension_numbers = #tpu.dot_dimension_numbers<[0], [0], [1], [1], [0, 1, 1, 1], [], []>} : vector<128x64xf32>, vector<128x64xf32>, vector<64x64xf32> -> vector<64x64xf32>
    %cst_22 = arith.constant dense<0xFF800000> : vector<64xf32>
    %45 = vector.multi_reduction <maximumf>, %44, %cst_22 [1] : vector<64x64xf32> to vector<64xf32>
    %46 = vector.shape_cast %45 : vector<64xf32> to vector<64x1xf32>
    %47 = vector.broadcast %46 : vector<64x1xf32> to vector<64x64xf32>
    %48 = arith.subf %44, %47 : vector<64x64xf32>
    %49 = math.exp %48 : vector<64x64xf32>
    %cst_23 = arith.constant dense<0.000000e+00> : vector<64xf32>
    %50 = vector.multi_reduction <add>, %49, %cst_23 [1] : vector<64x64xf32> to vector<64xf32>
    %51 = vector.shape_cast %50 : vector<64xf32> to vector<64x1xf32>
    %52 = tpu.reciprocal %51 {approx = true} : vector<64x1xf32> -> vector<64x1xf32>
    %53 = arith.mulf %51, %52 : vector<64x1xf32>
    %cst_24 = arith.constant 2.000000e+00 : f32
    %54 = vector.broadcast %cst_24 : f32 to vector<64x1xf32>
    %55 = arith.subf %54, %53 : vector<64x1xf32>
    %56 = arith.mulf %52, %55 : vector<64x1xf32>
    %57 = vector.broadcast %56 : vector<64x1xf32> to vector<64x64xf32>
    %58 = arith.mulf %49, %57 : vector<64x64xf32>
    %cst_25 = arith.constant dense<0.000000e+00> : vector<16x64xf32>
    %59 = tpu.matmul %43, %58, %cst_25 {dimension_numbers = #tpu.dot_dimension_numbers<[1], [1], [0], [0], [0, 0, 1, 0], [], []>} : vector<16x64xf32>, vector<64x64xf32>, vector<16x64xf32> -> vector<16x64xf32>
    %60 = vector.broadcast %0 : f32 to vector<16x64xf32>
    %61 = arith.mulf %60, %59 : vector<16x64xf32>
    %62 = arith.addf %61, %37 : vector<16x64xf32>
    %c1_26 = arith.constant 1 : index
    %c0_27 = arith.constant 0 : index
    %c0_28 = arith.constant 0 : index
    %63 = vector.load %arg6[%c1_26, %c0_27, %c0_28] : memref<2x16x64xf32, #tpu.memory_space<vmem>>, vector<1x16x64xf32>
    %64 = vector.shape_cast %63 : vector<1x16x64xf32> to vector<16x64xf32>
    %65 = vector.shape_cast %62 : vector<16x64xf32> to vector<1x16x64xf32>
    tpu.vector_store %arg6[%c1_26, %c0_27, %c0_28], %65 {strides = array<i32>} : memref<2x16x64xf32, #tpu.memory_space<vmem>>, vector<1x16x64xf32>,
    %c1_29 = arith.constant 1 : index
    %c0_30 = arith.constant 0 : index
    %c0_31 = arith.constant 0 : index
    %66 = vector.load %arg7[%c1_29, %c0_30, %c0_31] : memref<2x64x64xf32, #tpu.memory_space<vmem>>, vector<1x64x64xf32>
    %67 = vector.shape_cast %66 : vector<1x64x64xf32> to vector<64x64xf32>
    %68 = vector.shape_cast %58 : vector<64x64xf32> to vector<1x64x64xf32>
    tpu.vector_store %arg7[%c1_29, %c0_30, %c0_31], %68 {strides = array<i32>} : memref<2x64x64xf32, #tpu.memory_space<vmem>>, vector<1x64x64xf32>,
    return
  }
  func.func @transform_0(%arg0: i32, %arg1: i32) -> (i32, i32, i32) {
    %c0_i32 = arith.constant 0 : i32
    %c0_i32_0 = arith.constant 0 : i32
    %c0_i32_1 = arith.constant 0 : i32
    return %arg0, %c0_i32, %c0_i32_0 : i32, i32, i32
  }
  func.func @transform_1(%arg0: i32, %arg1: i32) -> (i32, i32) {
    %c0_i32 = arith.constant 0 : i32
    %c0_i32_0 = arith.constant 0 : i32
    %c0_i32_1 = arith.constant 0 : i32
    return %c0_i32, %c0_i32_0 : i32, i32
  }
  func.func @transform_2(%arg0: i32, %arg1: i32) -> (i32, i32) {
    %c0_i32 = arith.constant 0 : i32
    %c0_i32_0 = arith.constant 0 : i32
    %c0_i32_1 = arith.constant 0 : i32
    return %c0_i32, %c0_i32_0 : i32, i32
  }
  func.func @transform_3(%arg0: i32, %arg1: i32) -> i32 {
    %c0_i32 = arith.constant 0 : i32
    %c0_i32_0 = arith.constant 0 : i32
    return %c0_i32 : i32
  }
  func.func @transform_4(%arg0: i32, %arg1: i32) -> (i32, i32, i32) {
    %c0_i32 = arith.constant 0 : i32
    %c0_i32_0 = arith.constant 0 : i32
    return %arg0, %c0_i32, %arg1 : i32, i32, i32
  }
  func.func @transform_5(%arg0: i32, %arg1: i32) -> (i32, i32, i32) {
    %c0_i32 = arith.constant 0 : i32
    %c0_i32_0 = arith.constant 0 : i32
    return %arg0, %arg1, %c0_i32 : i32, i32, i32
  }
}

</mosaic_0001>

<bundles_post_ra>
// kernel: tpu_custom_call.1
= control target key start
LH: loop header
LB: loop body
LE: loop exit
PB: predicated region body
PF: predicated region fallthrough
CT: control target
= control target key end

     0   :  { %12 = vsyncpa [#allocation4], 0  ;;  %vm263_vm0 = vcmask 130048   ;;  %v2316_v4 = vmov 0   ;;  %s3120_s0 = inlined_call_operand.vmem [shape: f32[2,16,64], index: 0, kind: input, shape index: {}]   ;;  %s3121_s1 = inlined_call_operand.vmem [shape: f32[272,16], index: 1, kind: input, shape index: {}]   ;;  %s3122_s2 = inlined_call_operand.vmem [shape: f32[272,1], index: 2, kind: input, shape index: {}]   ;;  %s3123_s3 = inlined_call_operand.<no memory space> [shape: f32[1], index: 3, kind: input, shape index: {}]   ;;  %s3124_s4 = inlined_call_operand.hbm [shape: f32[2,16,64], index: 4, kind: output, shape index: {0}]   ;;  %s3125_s5 = inlined_call_operand.hbm [shape: f32[2,64,64], index: 5, kind: output, shape index: {1}]  }
   0x1   :  { %v2354_v0 = vld [vmem:[%s3120_s0] sm:$0xff]  ;;  %v2359_v1 = vld [vmem:[%s3120_s0 + $0x8] sm:$0xff]  ;;  %2202 = vset.pattern.permute.xlu0 %v2316_v4  ;;  %2203 = vset.pattern.permute.xlu1 %v2316_v4  ;;  %v2378_v6 = vld [vmem:[%s3121_s1 + $0x10] sm:$0xff] }
   0x2   :  { %3159 = vst [vmem:[#allocation9_spill] sm:$0xff] %v2354_v0  ;;  %3160 = vst [vmem:[#allocation10_spill] sm:$0xff] %v2359_v1  ;;  %v2364_v2 = vld [vmem:[%s3121_s1] sm:$0xff]  ;;  %v2077_v3 = vpack.c.bf16 %v2359_v1, %v2354_v0  ;;  %v2373_v5 = vld [vmem:[%s3121_s1 + $0x8] sm:$0xff] }
   0x3   :  { %1845 = vmatprep.mubr.msk.f32.mxu0 %vm263_vm0, %v2364_v2  ;;  %v57_v7 = vld [vmem:[%s3122_s2] sm:$0xff]  ;;  %v58_v8 = vld [vmem:[%s3122_s2 + $0x8] sm:$0xff]  ;;  %v59_v9 = vld [vmem:[%s3122_s2 + $0x10] sm:$0xff] }
   0x4   :  { %2078 = vmatprep.subr.bf16.mxu0 %v2077_v3  ;;  %95 = vperm.xlu0 %2202, %v57_v7   ;;  %v2396_v10 = vld [vmem:[%s3121_s1 + $0x18] sm:$0xff]  ;;  %v2401_v11 = vld [vmem:[%s3121_s1 + $0x20] sm:$0xff]  ;;  %v2416_v14 = vld [vmem:[%s3121_s1 + $0x28] sm:$0xff] }
   0x5   :  { %2080 = vmatpush3.bf16.msra.mxu0 %v2077_v3  ;;  %105 = vperm.xlu1 %2203, %v59_v9   ;;  %v60_v12 = vld [vmem:[%s3122_s2 + $0x18] sm:$0xff]  ;;  %v61_v13 = vld [vmem:[%s3122_s2 + $0x20] sm:$0xff]  ;;  %v2421_v15 = vld [vmem:[%s3121_s1 + $0x30] sm:$0xff] }
   0x6   :  { %v62_v16 = vld [vmem:[%s3122_s2 + $0x28] sm:$0xff]  ;;  %v63_v17 = vld [vmem:[%s3122_s2 + $0x30] sm:$0xff]  ;;  %v2436_v18 = vld [vmem:[%s3121_s1 + $0x38] sm:$0xff] }
   0x7   :  { %v2441_v19 = vld [vmem:[%s3121_s1 + $0x40] sm:$0xff]  ;;  %v64_v20 = vld [vmem:[%s3122_s2 + $0x38] sm:$0xff]  ;;  %v2456_v22 = vld [vmem:[%s3121_s1 + $0x48] sm:$0xff] }
   0x8   :  { %1846 = vmatmul.mubr.msk.f32.vlgmr.msra.gmra.mrb[0].mxu0 %vm263_vm0, %v2373_v5  ;;  %100 = vperm.xlu0 %2202, %v58_v8   ;;  %v65_v21 = vld [vmem:[%s3122_s2 + $0x40] sm:$0xff]  ;;  %v2461_v23 = vld [vmem:[%s3121_s1 + $0x50] sm:$0xff]  ;;  %v66_v24 = vld [vmem:[%s3122_s2 + $0x48] sm:$0xff] }
   0x9   :  { %1848 = vmatprep.mubr.msk.f32.mxu0 %vm263_vm0, %v2378_v6  ;;  %110 = vperm.xlu1 %2203, %v60_v12  }
   0xc   :  { %1849 = vmatmul.mubr.msk.f32.gmra.mrb[2].mxu0 %vm263_vm0, %v2396_v10  ;;  %115 = vperm.xlu0 %2202, %v61_v13  }
   0xd   :  { %1851 = vmatprep.mubr.msk.f32.mxu0 %vm263_vm0, %v2401_v11  ;;  %120 = vperm.xlu1 %2203, %v62_v16  }
  0x10   :  { %1852 = vmatmul.mubr.msk.f32.gmra.mrb[4].mxu0 %vm263_vm0, %v2416_v14  ;;  %125 = vperm.xlu0 %2202, %v63_v17  }
  0x11   :  { %1854 = vmatprep.mubr.msk.f32.mxu0 %vm263_vm0, %v2421_v15  ;;  %130 = vperm.xlu1 %2203, %v64_v20  }
  0x14   :  { %1855 = vmatmul.mubr.msk.f32.gmra.mrb[6].mxu0 %vm263_vm0, %v2436_v18  ;;  %135 = vperm.xlu0 %2202, %v65_v21  }
  0x15   :  { %1857 = vmatprep.mubr.msk.f32.mxu0 %vm263_vm0, %v2441_v19 }
  0x16   :  { %13 = vsyncpa [#allocation6], 0  ;;  %v67_v25 = vld [vmem:[%s3122_s2 + $0x50] sm:$0xff]  ;;  %v2476_v26 = vld [vmem:[%s3121_s1 + $0x58] sm:$0xff]  ;;  %140 = vperm.xlu1 %2203, %v66_v24   ;;  %vm738_vm1 = vcmask 523264  }
  0x17   :  { %v2481_v27 = vld [vmem:[%s3121_s1 + $0x60] sm:$0xff]  ;;  %v68_v28 = vld [vmem:[%s3122_s2 + $0x58] sm:$0xff]  ;;  %v2496_v30 = vld [vmem:[%s3121_s1 + $0x68] sm:$0xff] }
  0x18   :  { %1858 = vmatmul.mubr.msk.f32.gmra.mrb[8].mxu0 %vm263_vm0, %v2456_v22  ;;  %145 = vperm.xlu0 %2202, %v67_v25   ;;  %v69_v29 = vld [vmem:[%s3122_s2 + $0x60] sm:$0xff]  ;;  %v2501_v31 = vld [vmem:[%s3121_s1 + $0x70] sm:$0xff]  ;;  %v70_v32 = vld [vmem:[%s3122_s2 + $0x68] sm:$0xff] }
  0x19   :  { %1860 = vmatprep.mubr.msk.f32.mxu0 %vm263_vm0, %v2461_v23  ;;  %v71_v33 = vld [vmem:[%s3122_s2 + $0x70] sm:$0xff]  ;;  %v2516_v34 = vld [vmem:[%s3121_s1 + $0x78] sm:$0xff]  ;;  %v2521_v35 = vld [vmem:[%s3121_s1 + $0x80] sm:$0xff] }
  0x1a   :  { %150 = vperm.xlu1 %2203, %v68_v28   ;;  %v72_v36 = vld [vmem:[%s3122_s2 + $0x78] sm:$0xff]  ;;  %v73_v37 = vld [vmem:[%s3122_s2 + $0x80] sm:$0xff]  ;;  %v2536_v38 = vld [vmem:[%s3121_s1 + $0x88] sm:$0xff] }
  0x1b   :  { %v2541_v39 = vld [vmem:[%s3121_s1 + $0x90] sm:$0xff]  ;;  %v74_v40 = vld [vmem:[%s3122_s2 + $0x88] sm:$0xff]  ;;  %v2556_v42 = vld [vmem:[%s3121_s1 + $0x98] sm:$0xff] }
  0x1c   :  { %1861 = vmatmul.mubr.msk.f32.gmra.mrb[10].mxu0 %vm263_vm0, %v2476_v26  ;;  %155 = vperm.xlu0 %2202, %v69_v29   ;;  %v75_v41 = vld [vmem:[%s3122_s2 + $0x90] sm:$0xff]  ;;  %v2561_v43 = vld [vmem:[%s3121_s1 + $0xa0] sm:$0xff]  ;;  %v76_v44 = vld [vmem:[%s3122_s2 + $0x98] sm:$0xff] }
  0x1d   :  { %1863 = vmatprep.mubr.msk.f32.mxu0 %vm263_vm0, %v2481_v27  ;;  %v77_v45 = vld [vmem:[%s3122_s2 + $0xa0] sm:$0xff]  ;;  %v2576_v46 = vld [vmem:[%s3121_s1 + $0xa8] sm:$0xff]  ;;  %v2581_v47 = vld [vmem:[%s3121_s1 + $0xb0] sm:$0xff] }
  0x1e   :  { %160 = vperm.xlu1 %2203, %v70_v32   ;;  %v78_v48 = vld [vmem:[%s3122_s2 + $0xa8] sm:$0xff]  ;;  %v79_v49 = vld [vmem:[%s3122_s2 + $0xb0] sm:$0xff]  ;;  %v2596_v50 = vld [vmem:[%s3121_s1 + $0xb8] sm:$0xff] }
  0x1f   :  { %v2601_v51 = vld [vmem:[%s3121_s1 + $0xc0] sm:$0xff]  ;;  %v80_v52 = vld [vmem:[%s3122_s2 + $0xb8] sm:$0xff]  ;;  %v2616_v54 = vld [vmem:[%s3121_s1 + $0xc8] sm:$0xff] }
  0x20   :  { %1864 = vmatmul.mubr.msk.f32.gmra.mrb[12].mxu0 %vm263_vm0, %v2496_v30  ;;  %165 = vperm.xlu0 %2202, %v71_v33   ;;  %v81_v53 = vld [vmem:[%s3122_s2 + $0xc0] sm:$0xff]  ;;  %v2621_v55 = vld [vmem:[%s3121_s1 + $0xd0] sm:$0xff]  ;;  %v82_v56 = vld [vmem:[%s3122_s2 + $0xc8] sm:$0xff] }
  0x21   :  { %1866 = vmatprep.mubr.msk.f32.mxu0 %vm263_vm0, %v2501_v31  ;;  %v83_v57 = vld [vmem:[%s3122_s2 + $0xd0] sm:$0xff]  ;;  %v2636_v58 = vld [vmem:[%s3121_s1 + $0xd8] sm:$0xff]  ;;  %v2641_v59 = vld [vmem:[%s3121_s1 + $0xe0] sm:$0xff] }
  0x22   :  { %170 = vperm.xlu1 %2203, %v72_v36   ;;  %v84_v60 = vld [vmem:[%s3122_s2 + $0xd8] sm:$0xff]  ;;  %v85_v61 = vld [vmem:[%s3122_s2 + $0xe0] sm:$0xff]  ;;  %v2656_v62 = vld [vmem:[%s3121_s1 + $0xe8] sm:$0xff] }
  0x23   :  { %3161 = vst [vmem:[#allocation11_spill] sm:$0xff] %v2656_v62  ;;  %v2661_v63 = vld [vmem:[%s3121_s1 + $0xf0] sm:$0xff]  ;;  %v86_v3 = vld [vmem:[%s3122_s2 + $0xe8] sm:$0xff]  ;;  %v2676_v7 = vld [vmem:[%s3121_s1 + $0xf8] sm:$0xff] }
  0x24   :  { %1867 = vmatmul.mubr.msk.f32.gmra.mrb[14].mxu0 %vm263_vm0, %v2516_v34  ;;  %175 = vperm.xlu0 %2202, %v73_v37   ;;  %3162 = vst [vmem:[#allocation12_spill] sm:$0xff] %v2661_v63  ;;  %v87_v4 = vld [vmem:[%s3122_s2 + $0xf0] sm:$0xff]  ;;  %3163 = vst [vmem:[#allocation13_spill] sm:$0xff] %v2676_v7  ;;  %v88_v8 = vld [vmem:[%s3122_s2 + $0xf8] sm:$0xff] }
  0x25   :  { %1869 = vmatprep.mubr.msk.f32.mxu0 %vm263_vm0, %v2521_v35  ;;  %vm2855_vm2 = vmpackc.low %vm738_vm1, %vm738_vm1 }
  0x26   :  { %180 = vperm.xlu1 %2203, %v74_v40  }
  0x28   :  { %1870 = vmatmul.mubr.msk.f32.gmra.mrb[16].mxu0 %vm263_vm0, %v2536_v38  ;;  %185 = vperm.xlu0 %2202, %v75_v41  }
  0x29   :  { %1872 = vmatprep.mubr.msk.f32.mxu0 %vm263_vm0, %v2541_v39 }
  0x2a   :  { %190 = vperm.xlu1 %2203, %v76_v44  }
  0x2c   :  { %1873 = vmatmul.mubr.msk.f32.gmra.mrb[18].mxu0 %vm263_vm0, %v2556_v42  ;;  %195 = vperm.xlu0 %2202, %v77_v45  }
  0x2d   :  { %1875 = vmatprep.mubr.msk.f32.mxu0 %vm263_vm0, %v2561_v43 }
  0x2e   :  { %200 = vperm.xlu1 %2203, %v78_v48  }
  0x30   :  { %1876 = vmatmul.mubr.msk.f32.gmra.mrb[20].mxu0 %vm263_vm0, %v2576_v46  ;;  %205 = vperm.xlu0 %2202, %v79_v49  }
  0x31   :  { %1878 = vmatprep.mubr.msk.f32.mxu0 %vm263_vm0, %v2581_v47 }
  0x32   :  { %210 = vperm.xlu1 %2203, %v80_v52  }
  0x34   :  { %1879 = vmatmul.mubr.msk.f32.gmra.mrb[22].mxu0 %vm263_vm0, %v2596_v50  ;;  %215 = vperm.xlu0 %2202, %v81_v53  }
  0x35   :  { %1881 = vmatprep.mubr.msk.f32.mxu0 %vm263_vm0, %v2601_v51 }
  0x36   :  { %220 = vperm.xlu1 %2203, %v82_v56  }
  0x38   :  { %1882 = vmatmul.mubr.msk.f32.gmra.mrb[24].mxu0 %vm263_vm0, %v2616_v54  ;;  %225 = vperm.xlu0 %2202, %v83_v57  }
  0x39   :  { %1884 = vmatprep.mubr.msk.f32.mxu0 %vm263_vm0, %v2621_v55 }
  0x3a   :  { %230 = vperm.xlu1 %2203, %v84_v60  }
  0x3c   :  { %1885 = vmatmul.mubr.msk.f32.gmra.mrb[26].mxu0 %vm263_vm0, %v2636_v58  ;;  %235 = vperm.xlu0 %2202, %v85_v61  }
  0x3d   :  { %1887 = vmatprep.mubr.msk.f32.mxu0 %vm263_vm0, %v2641_v59 }
  0x3e   :  { %240 = vperm.xlu1 %2203, %v86_v3  }
  0x40   :  { %1888 = vmatmul.mubr.msk.f32.gmra.mrb[28].mxu0 %vm263_vm0, %v2656_v62  ;;  %245 = vperm.xlu0 %2202, %v87_v4  }
  0x41   :  { %1890 = vmatprep.mubr.msk.f32.mxu0 %vm263_vm0, %v2661_v63 }
  0x42   :  { %250 = vperm.xlu1 %2203, %v88_v8  }
  0x44   :  { %1891 = vmatmul.mubr.msk.f32.gmra.mrb[30].mxu0 %vm263_vm0, %v2676_v7 }
  0x83   :  { %v2685_v12 = vpop.permute.xlu0 %95 }
  0x84   :  { %v2683_v9 = vpop.permute.xlu1 %105  ;;  %3165 = vst [vmem:[#allocation15_spill] sm:$0xff] %v2685_v12 }
  0x85   :  { %3164 = vst [vmem:[#allocation14_spill] sm:$0xff] %v2683_v9 }
  0x87   :  { %v2689_v16 = vpop.permute.xlu0 %100 }
  0x88   :  { %v2687_v13 = vpop.permute.xlu1 %110  ;;  %3167 = vst [vmem:[#allocation17_spill] sm:$0xff] %v2689_v16 }
  0x89   :  { %3166 = vst [vmem:[#allocation16_spill] sm:$0xff] %v2687_v13 }
  0x8b   :  { %v2693_v20 = vpop.permute.xlu0 %115 }
  0x8c   :  { %v2691_v17 = vpop.permute.xlu1 %120  ;;  %3169 = vst [vmem:[#allocation19_spill] sm:$0xff] %v2693_v20 }
  0x8d   :  { %3168 = vst [vmem:[#allocation18_spill] sm:$0xff] %v2691_v17 }
  0x8f   :  { %v2697_v24 = vpop.permute.xlu0 %125 }
  0x90   :  { %v2695_v21 = vpop.permute.xlu1 %130  ;;  %3171 = vst [vmem:[#allocation21_spill] sm:$0xff] %v2697_v24 }
  0x91   :  { %3170 = vst [vmem:[#allocation20_spill] sm:$0xff] %v2695_v21 }
  0x93   :  { %v2701_v28 = vpop.permute.xlu0 %135 }
  0x94   :  { %3172 = vst [vmem:[#allocation22_spill] sm:$0xff] %v2701_v28 }
  0x95   :  { %v2699_v25 = vpop.permute.xlu1 %140 }
  0x97   :  { %v2705_v33 = vpop.permute.xlu0 %145 }
  0x98   :  { %3174 = vst [vmem:[#allocation24_spill] sm:$0xff] %v2705_v33 }
  0x99   :  { %v2703_v29 = vpop.permute.xlu1 %150 }
  0x9a   :  { %3173 = vst [vmem:[#allocation23_spill] sm:$0xff] %v2703_v29 }
  0x9b   :  { %v2711_v48 = vpop.permute.xlu0 %155 }
  0x9c   :  { %3176 = vst [vmem:[#allocation26_spill] sm:$0xff] %v2711_v48 }
  0x9d   :  { %v2708_v44 = vpop.permute.xlu1 %160 }
  0x9e   :  { %3175 = vst [vmem:[#allocation25_spill] sm:$0xff] %v2708_v44 }
  0x9f   :  { %v2716_v60 = vpop.permute.xlu0 %165 }
  0xa0   :  { %3178 = vst [vmem:[#allocation28_spill] sm:$0xff] %v2716_v60 }
  0xa1   :  { %v2714_v56 = vpop.permute.xlu1 %170 }
  0xa2   :  { %3177 = vst [vmem:[#allocation27_spill] sm:$0xff] %v2714_v56 }
  0xdb   :  { %v1847_v32 = vpop.f32.mrb[0].mxu0 }
  0xdc   :  { %v432_v36 = vpop.f32.mrb[1].mxu0  ;;  %v438_v45 = vadd.f32 %v1847_v32, %v2689_v16  ;;  %v2719_v32 = vpop.permute.xlu1 %180 }
  0xdd   :  { %v433_v37 = vadd.f32 %v432_v36, %v2685_v12 }
  0xdf   :  { %601 = vxpose.xlu0.b32.start [1/16] (narrow) %v433_v37, 64  ;;  %v1850_v40 = vpop.f32.mrb[2].mxu0  ;;  %v2722_v37 = vpop.permute.xlu0 %175 }
  0xe0   :  { %v442_v41 = vpop.f32.mrb[3].mxu0  ;;  %v448_v3 = vadd.f32 %v1850_v40, %v2687_v13  ;;  %3179 = vst [vmem:[#allocation29_spill] sm:$0xff] %v2722_v37 }
  0xe1   :  { %v443_v49 = vadd.f32 %v442_v41, %v2683_v9 }
  0xe3   :  { %v1853_v52 = vpop.f32.mrb[4].mxu0  ;;  %602 = vxpose.xlu0.b32.cont [2/16] (narrow) %v438_v45, 64  ;;  %v2729_v40 = vpop.permute.xlu0 %185 }
  0xe4   :  { %v452_v53 = vpop.f32.mrb[5].mxu0  ;;  %v458_v9 = vadd.f32 %v1853_v52, %v2691_v17 }
  0xe5   :  { %v453_v36 = vadd.f32 %v452_v53, %v2693_v20 }
  0xe7   :  { %v1856_v57 = vpop.f32.mrb[6].mxu0  ;;  %603 = vxpose.xlu0.b32.cont [3/16] (narrow) %v443_v49, 64  ;;  %v2725_v49 = vpop.permute.xlu1 %190 }
  0xe8   :  { %v462_v61 = vpop.f32.mrb[7].mxu0  ;;  %v2739_v52 = vpop.permute.xlu0 %195 }
  0xe9   :  { %v463_v13 = vadd.f32 %v462_v61, %v2697_v24  ;;  %3181 = vst [vmem:[#allocation31_spill] sm:$0xff] %v2739_v52 }
  0xeb   :  { %v1859_v4 = vpop.f32.mrb[8].mxu0  ;;  %604 = vxpose.xlu0.b32.cont [4/16] (narrow) %v448_v3, 64  ;;  %v2736_v20 = vpop.permute.xlu1 %200 }
  0xec   :  { %v472_v8 = vpop.f32.mrb[9].mxu0  ;;  %3180 = vst [vmem:[#allocation30_spill] sm:$0xff] %v2736_v20  ;;  %v2746_v63 = vpop.permute.xlu0 %205  ;;  %v478_v62 = vadd.f32 %v1859_v4, %v2699_v25 }
  0xed   :  { %v473_v1 = vadd.f32 %v472_v8, %v2701_v28  ;;  %3183 = vst [vmem:[#allocation33_spill] sm:$0xff] %v2746_v63 }
  0xef   :  { %v1862_v41 = vpop.f32.mrb[10].mxu0  ;;  %605 = vxpose.xlu0.b32.cont [5/16] (narrow) %v453_v36, 64  ;;  %v468_v36 = vadd.f32 %v1856_v57, %v2695_v21  ;;  %v2744_v24 = vpop.permute.xlu1 %210 }
  0xf0   :  { %v482_v45 = vpop.f32.mrb[11].mxu0  ;;  %3182 = vst [vmem:[#allocation32_spill] sm:$0xff] %v2744_v24 }
  0xf3   :  { %v2727_v16 = vpop.f32.mrb[12].mxu0  ;;  %606 = vxpose.xlu0.b32.cont [6/16] (narrow) %v458_v9, 64  ;;  %v2752_v28 = vpop.permute.xlu1 %220 }
  0xf4   :  { %v492_v3 = vpop.f32.mrb[13].mxu0  ;;  %3184 = vst [vmem:[#allocation34_spill] sm:$0xff] %v2752_v28 }
  0xf7   :  { %v2732_v12 = vpop.f32.mrb[14].mxu0  ;;  %607 = vxpose.xlu0.b32.cont [7/16] (narrow) %v463_v13, 64 }
  0xf8   :  { %v2734_v53 = vpop.f32.mrb[15].mxu0 }
  0xfb   :  { %v1871_v17 = vpop.f32.mrb[16].mxu0  ;;  %608 = vxpose.xlu0.b32.cont [8/16] (narrow) %v468_v36, 64 }
  0xfc   :  { %v518_v9 = vadd.f32 %v1871_v17, %v2719_v32  ;;  %v512_v0 = vpop.f32.mrb[17].mxu0 }
  0xfd   :  { %v513_v61 = vadd.f32 %v512_v0, %v2722_v37 }
  0xff   :  { %v1874_v13 = vpop.f32.mrb[18].mxu0  ;;  %609 = vxpose.xlu0.b32.cont [9/16] (narrow) %v473_v1, 64  ;;  %v2081_v7 = vpack.c.bf16 %v518_v9, %v513_v61  ;;  %v483_v1 = vadd.f32 %v482_v45, %v2705_v33  ;;  %v2756_v61 = vpop.permute.xlu0 %215 }
 0x100   :  { %v528_v57 = vadd.f32 %v1874_v13, %v2725_v49  ;;  %v522_v21 = vpop.f32.mrb[19].mxu0  ;;  %3185 = vst [vmem:[#allocation35_spill] sm:$0xff] %v2756_v61 }
 0x101   :  { %v523_v36 = vadd.f32 %v522_v21, %v2729_v40  ;;  %2082 = vmatprep.subr.bf16.mxu1 %v2081_v7 }
 0x102   :  { %2084 = vmatpush3.bf16.msra.mxu1 %v2081_v7 }
 0x103   :  { %v2085_v17 = vpack.c.bf16 %v528_v57, %v523_v36  ;;  %v1877_v8 = vpop.f32.mrb[20].mxu0  ;;  %610 = vxpose.xlu0.b32.cont [10/16] (narrow) %v478_v62, 64  ;;  %v488_v62 = vadd.f32 %v1862_v41, %v2703_v29  ;;  %v2761_v36 = vpop.permute.xlu1 %230 }
 0x104   :  { %v538_v0 = vadd.f32 %v1877_v8, %v2736_v20  ;;  %v532_v37 = vpop.f32.mrb[21].mxu0  ;;  %3186 = vst [vmem:[#allocation36_spill] sm:$0xff] %v2761_v36  ;;  %v2763_v8 = vpop.permute.xlu0 %225 }
 0x105   :  { %v533_v9 = vadd.f32 %v532_v37, %v2739_v52  ;;  %2086 = vmatprep.subr.bf16.mxu1 %v2085_v17  ;;  %3187 = vst [vmem:[#allocation37_spill] sm:$0xff] %v2763_v8 }
 0x106   :  { %2088 = vmatpush3.bf16.msra.mxu1 %v2085_v17 }
 0x107   :  { %v2089_v4 = vpack.c.bf16 %v538_v0, %v533_v9  ;;  %v1880_v21 = vpop.f32.mrb[22].mxu0  ;;  %611 = vxpose.xlu0.b32.cont [11/16] (narrow) %v483_v1, 64  ;;  %v493_v1 = vadd.f32 %v492_v3, %v2711_v48 }
 0x108   :  { %v548_v7 = vadd.f32 %v1880_v21, %v2744_v24  ;;  %v542_v13 = vpop.f32.mrb[23].mxu0 }
 0x109   :  { %v543_v57 = vadd.f32 %v542_v13, %v2746_v63  ;;  %2090 = vmatprep.subr.bf16.mxu1 %v2089_v4 }
 0x10a   :  { %2092 = vmatpush3.bf16.msra.mxu1 %v2089_v4 }
 0x10b   :  { %v2093_v45 = vpack.c.bf16 %v548_v7, %v543_v57  ;;  %v1883_v37 = vpop.f32.mrb[24].mxu0  ;;  %612 = vxpose.xlu0.b32.cont [12/16] (narrow) %v488_v62, 64  ;;  %v2769_v7 = vpop.permute.xlu1 %240  ;;  %v498_v62 = vadd.f32 %v2727_v16, %v2708_v44 }
 0x10c   :  { %v558_v17 = vadd.f32 %v1883_v37, %v2752_v28  ;;  %v552_v0 = vpop.f32.mrb[25].mxu0  ;;  %3188 = vst [vmem:[#allocation38_spill] sm:$0xff] %v2769_v7  ;;  %v2774_v37 = vpop.permute.xlu0 %235 }
 0x10d   :  { %v553_v9 = vadd.f32 %v552_v0, %v2756_v61  ;;  %2094 = vmatprep.subr.bf16.mxu1 %v2093_v45  ;;  %3189 = vst [vmem:[#allocation39_spill] sm:$0xff] %v2774_v37 }
 0x10e   :  { %2096 = vmatpush3.bf16.msra.mxu1 %v2093_v45 }
 0x10f   :  { %v2097_v41 = vpack.c.bf16 %v558_v17, %v553_v9  ;;  %v1886_v21 = vpop.f32.mrb[26].mxu0  ;;  %613 = vxpose.xlu0.b32.cont [13/16] (narrow) %v493_v1, 64  ;;  %v503_v1 = vadd.f32 %v2734_v53, %v2716_v60  ;;  %v2780_v16 = vpop.permute.xlu1 %250 }
 0x110   :  { %v568_v4 = vadd.f32 %v1886_v21, %v2761_v36  ;;  %v562_v13 = vpop.f32.mrb[27].mxu0  ;;  %3190 = vst [vmem:[#allocation40_spill] sm:$0xff] %v2780_v16 }
 0x111   :  { %v563_v57 = vadd.f32 %v562_v13, %v2763_v8  ;;  %2098 = vmatprep.subr.bf16.mxu1 %v2097_v41  ;;  %v2782_v8 = vpop.permute.xlu0 %245 }
 0x112   :  { %2100 = vmatpush3.bf16.msra.mxu1 %v2097_v41  ;;  %3191 = vst [vmem:[#allocation41_spill] sm:$0xff] %v2782_v8 }
 0x113   :  { %v2101_v3 = vpack.c.bf16 %v568_v4, %v563_v57  ;;  %v1889_v0 = vpop.f32.mrb[28].mxu0  ;;  %614 = vxpose.xlu0.b32.cont [14/16] (narrow) %v498_v62, 64  ;;  %v508_v62 = vadd.f32 %v2732_v12, %v2714_v56 }
 0x114   :  { %v578_v45 = vadd.f32 %v1889_v0, %v2769_v7  ;;  %v572_v17 = vpop.f32.mrb[29].mxu0 }
 0x115   :  { %v573_v9 = vadd.f32 %v572_v17, %v2774_v37  ;;  %2102 = vmatprep.subr.bf16.mxu1 %v2101_v3 }
 0x116   :  { %2104 = vmatpush3.bf16.msra.mxu1 %v2101_v3 }
 0x117   :  { %v2105_v21 = vpack.c.bf16 %v578_v45, %v573_v9  ;;  %v1892_v13 = vpop.f32.mrb[30].mxu0  ;;  %615 = vxpose.xlu0.b32.cont [15/16] (narrow) %v503_v1, 64 }
 0x118   :  { %v588_v41 = vadd.f32 %v1892_v13, %v2780_v16  ;;  %v582_v4 = vpop.f32.mrb[31].mxu0 }
 0x119   :  { %v583_v57 = vadd.f32 %v582_v4, %v2782_v8  ;;  %2106 = vmatprep.subr.bf16.mxu1 %v2105_v21 }
 0x11a   :  { %2108 = vmatpush3.bf16.msra.mxu1 %v2105_v21  ;;  %v2791_v21 = vld [vmem:[%s3121_s1 + $0x100] sm:$0xff] }
 0x11b   :  { %v2109_v53 = vpack.c.bf16 %v588_v41, %v583_v57  ;;  %616 = vxpose.xlu0.b32.end [16/16] (narrow) %v508_v62, 64  ;;  %v2796_v41 = vld [vmem:[%s3121_s1 + $0x108] sm:$0xff]  ;;  %1893 = vmatprep.mubr.msk.f32.mxu0 %vm263_vm0, %v2791_v21 }
 0x11c   :  { %1894 = vmatmul.mubr.msk.f32.gmra.mrb[32].mxu0 %vm263_vm0, %v2796_v41 }
 0x11d   :  { %2110 = vmatprep.subr.bf16.mxu1 %v2109_v53 }
 0x11e   :  { %2112 = vmatpush3.bf16.msra.mxu1 %v2109_v53 }
 0x15f   :  { %v617_v3 = vpop.trf.xlu0 }
 0x160   :  { %1928 = vmatprep.mubr.f32.mxu1 %v617_v3 }
 0x163   :  { %v618_v0 = vpop.trf.xlu0 }
 0x164   :  { %1929 = vmatmul.mubr.f32.vlgmr.msra.gmra.mrb[0].mxu1 %v618_v0 }
 0x167   :  { %v619_v45 = vpop.trf.xlu0 }
 0x168   :  { %1931 = vmatprep.mubr.f32.mxu1 %v619_v45 }
 0x16b   :  { %v620_v17 = vpop.trf.xlu0 }
 0x16c   :  { %1932 = vmatmul.mubr.f32.gmra.mrb[2].mxu1 %v620_v17 }
 0x16f   :  { %v621_v1 = vpop.trf.xlu0 }
 0x170   :  { %1934 = vmatprep.mubr.f32.mxu1 %v621_v1 }
 0x173   :  { %v622_v9 = vpop.trf.xlu0 }
 0x174   :  { %1935 = vmatmul.mubr.f32.gmra.mrb[4].mxu1 %v622_v9 }
 0x177   :  { %v623_v12 = vpop.trf.xlu0 }
 0x178   :  { %1937 = vmatprep.mubr.f32.mxu1 %v623_v12 }
 0x17b   :  { %v624_v13 = vpop.trf.xlu0 }
 0x17c   :  { %1938 = vmatmul.mubr.f32.gmra.mrb[6].mxu1 %v624_v13 }
 0x237   :  { %v1930_v4 = vpop.f32.mrb[0].mxu1 }
 0x238   :  { %v699_v62 = vpop.f32.mrb[1].mxu1  ;;  %v742_v57 = vsel %vm738_vm1, %v1930_v4, -inf }
 0x239   :  { %743 = vmax.xlane.f32.xlu1 %v742_v57  ;;  %v739_v53 = vsel %vm738_vm1, %v699_v62, -inf }
 0x23d   :  { %740 = vmax.xlane.f32.xlu1 %v739_v53 }
 0x23f   :  { %v1933_v3 = vpop.f32.mrb[2].mxu1 }
 0x240   :  { %v709_v0 = vpop.f32.mrb[3].mxu1  ;;  %v748_v45 = vsel %vm738_vm1, %v1933_v3, -inf }
 0x241   :  { %749 = vmax.xlane.f32.xlu1 %v748_v45  ;;  %v745_v17 = vsel %vm738_vm1, %v709_v0, -inf }
 0x245   :  { %746 = vmax.xlane.f32.xlu1 %v745_v17 }
 0x247   :  { %v1936_v1 = vpop.f32.mrb[4].mxu1 }
 0x248   :  { %v719_v9 = vpop.f32.mrb[5].mxu1  ;;  %v754_v12 = vsel %vm738_vm1, %v1936_v1, -inf }
 0x249   :  { %755 = vmax.xlane.f32.xlu1 %v754_v12  ;;  %v751_v13 = vsel %vm738_vm1, %v719_v9, -inf }
 0x24d   :  { %752 = vmax.xlane.f32.xlu1 %v751_v13 }
 0x24f   :  { %v1939_v57 = vpop.f32.mrb[6].mxu1 }
 0x250   :  { %v729_v8 = vpop.f32.mrb[7].mxu1  ;;  %v760_v56 = vsel %vm738_vm1, %v1939_v57, -inf }
 0x251   :  { %v757_v53 = vsel %vm738_vm1, %v729_v8, -inf }
 0x252   :  { %758 = vmax.xlane.f32.xlu1 %v757_v53 }
 0x256   :  { %761 = vmax.xlane.f32.xlu1 %v760_v56 }
 0x2c6   :  { %v744_v45 = vpop.xlane.xlu1 %743 }
 0x2c7   :  { %v764_v16 = vsub.f32 %v1930_v4, %v744_v45 }
 0x2c9   :  { %v773_v37 = vmul.f32 1.442695, %v764_v16 }
 0x2ca   :  { %v741_v17 = vpop.xlane.xlu1 %740 }
 0x2cb   :  { %2204 = vpow2.f32 %v773_v37  ;;  %v763_v60 = vsub.f32 %v699_v62, %v741_v17 }
 0x2cd   :  { %v771_v7 = vmul.f32 1.442695, %v763_v60 }
 0x2ce   :  { %v750_v44 = vpop.xlane.xlu1 %749 }
 0x2cf   :  { %2206 = vpow2.f32 %v771_v7  ;;  %v766_v12 = vsub.f32 %v1933_v3, %v750_v44 }
 0x2d1   :  { %v777_v36 = vmul.f32 1.442695, %v766_v12 }
 0x2d2   :  { %v747_v13 = vpop.xlane.xlu1 %746 }
 0x2d3   :  { %2208 = vpow2.f32 %v777_v36  ;;  %v765_v61 = vsub.f32 %v709_v0, %v747_v13 }
 0x2d5   :  { %v2810_v48 = vpop.eup %2204  ;;  %v775_v53 = vmul.f32 1.442695, %v765_v61 }
 0x2d6   :  { %v756_v28 = vpop.xlane.xlu1 %755  ;;  %v790_v56 = vsel %vm738_vm1, %v2810_v48, 0.0 }
 0x2d7   :  { %2210 = vpow2.f32 %v775_v53  ;;  %v768_v16 = vsub.f32 %v1936_v1, %v756_v28  ;;  %791 = vadd.xlane.f32.xlu1 %v790_v56 }
 0x2d9   :  { %v2814_v37 = vpop.eup %2206  ;;  %v781_v60 = vmul.f32 1.442695, %v768_v16 }
 0x2da   :  { %v753_v4 = vpop.xlane.xlu1 %752  ;;  %v787_v44 = vsel %vm738_vm1, %v2814_v37, 0.0 }
 0x2db   :  { %2212 = vpow2.f32 %v781_v60  ;;  %v767_v36 = vsub.f32 %v719_v9, %v753_v4  ;;  %788 = vadd.xlane.f32.xlu1 %v787_v44  ;;  %v2841_v60 = vpop.f32.mrb[32].mxu0 }
 0x2dc   :  { %v592_v4 = vpop.f32.mrb[33].mxu0 }
 0x2dd   :  { %v2818_v7 = vpop.eup %2208  ;;  %v779_v61 = vmul.f32 1.442695, %v767_v36 }
 0x2de   :  { %v796_v62 = vsel %vm738_vm1, %v2818_v7, 0.0 }
 0x2df   :  { %2214 = vpow2.f32 %v779_v61  ;;  %797 = vadd.xlane.f32.xlu1 %v796_v62  ;;  %v759_v28 = vpop.xlane.xlu1 %758 }
 0x2e0   :  { %v769_v44 = vsub.f32 %v729_v8, %v759_v28 }
 0x2e1   :  { %v2822_v3 = vpop.eup %2210 }
 0x2e2   :  { %v793_v0 = vsel %vm738_vm1, %v2822_v3, 0.0  ;;  %v783_v36 = vmul.f32 1.442695, %v769_v44 }
 0x2e3   :  { %794 = vadd.xlane.f32.xlu1 %v793_v0  ;;  %v762_v1 = vpop.xlane.xlu1 %761  ;;  %v90_v0 = vld [vmem:[%s3122_s2 + $0x108] sm:$0xff] }
 0x2e4   :  { %v770_v45 = vsub.f32 %v1939_v57, %v762_v1  ;;  %v89_v57 = vld [vmem:[%s3122_s2 + $0x100] sm:$0xff] }
 0x2e5   :  { %v2826_v17 = vpop.eup %2212 }
 0x2e6   :  { %v785_v9 = vmul.f32 1.442695, %v770_v45  ;;  %v802_v12 = vsel %vm738_vm1, %v2826_v17, 0.0 }
 0x2e7   :  { %803 = vadd.xlane.f32.xlu1 %v802_v12 }
 0x2e8   :  { %2216 = vpow2.f32 %v785_v9 }
 0x2e9   :  { %v2830_v13 = vpop.eup %2214  ;;  %2218 = vpow2.f32 %v783_v36 }
 0x2ea   :  { %v799_v53 = vsel %vm738_vm1, %v2830_v13, 0.0 }
 0x2eb   :  { %800 = vadd.xlane.f32.xlu1 %v799_v53 }
 0x2f2   :  { %v2834_v56 = vpop.eup %2216 }
 0x2f3   :  { %v808_v16 = vsel %vm738_vm1, %v2834_v56, 0.0  ;;  %v2843_v61 = vpop.eup %2218 }
 0x2f4   :  { %809 = vadd.xlane.f32.xlu0 %v808_v16  ;;  %v805_v62 = vsel %vm738_vm1, %v2843_v61, 0.0 }
 0x2fc   :  { %255 = vperm.xlu1 %2203, %v89_v57  }
 0x320   :  { %806 = vadd.xlane.f32.xlu1 %v805_v62 }
 0x331   :  { %260 = vperm.xlu1 %2203, %v90_v0  }
 0x364   :  { %v792_v1 = vpop.xlane.xlu1 %791 }
 0x365   :  { %2220 = vrcp.f32 %v792_v1 }
 0x368   :  { %v789_v45 = vpop.xlane.xlu1 %788 }
 0x369   :  { %2222 = vrcp.f32 %v789_v45 }
 0x36c   :  { %v798_v9 = vpop.xlane.xlu1 %797 }
 0x36d   :  { %2224 = vrcp.f32 %v798_v9 }
 0x36f   :  { %v2221_v8 = vpop.eup %2220 }
 0x370   :  { %v820_v28 = vmul.f32 %v2221_v8, %v792_v1  ;;  %v795_v12 = vpop.xlane.xlu1 %794 }
 0x371   :  { %2226 = vrcp.f32 %v795_v12 }
 0x372   :  { %v828_v53 = vsub.f32 2.0, %v820_v28 }
 0x373   :  { %v2223_v16 = vpop.eup %2222 }
 0x374   :  { %v836_v57 = vmul.f32 %v2221_v8, %v828_v53  ;;  %v819_v44 = vmul.f32 %v2223_v16, %v789_v45  ;;  %v804_v36 = vpop.xlane.xlu1 %803 }
 0x375   :  { %2228 = vrcp.f32 %v804_v36 }
 0x376   :  { %v844_v62 = vmul.f32 %v2810_v48, %v836_v57  ;;  %v827_v63 = vsub.f32 2.0, %v819_v44 }
 0x377   :  { %v2225_v0 = vpop.eup %2224 }
 0x378   :  { %964 = vst.msk [vmem:[#allocation5 + $0x8] sm:$0xff] %vm738_vm1, %v844_v62  ;;  %v835_v29 = vmul.f32 %v2223_v16, %v827_v63  ;;  %v822_v24 = vmul.f32 %v2225_v0, %v798_v9  ;;  %v801_v52 = vpop.xlane.xlu1 %800 }
 0x379   :  { %2230 = vrcp.f32 %v801_v52 }
 0x37a   :  { %v843_v1 = vmul.f32 %v2814_v37, %v835_v29  ;;  %v830_v33 = vsub.f32 2.0, %v822_v24 }
 0x37b   :  { %v2227_v20 = vpop.eup %2226 }
 0x37c   :  { %963 = vst.msk [vmem:[#allocation5] sm:$0xff] %vm738_vm1, %v843_v1  ;;  %v838_v48 = vmul.f32 %v2225_v0, %v830_v33  ;;  %v821_v8 = vmul.f32 %v2227_v20, %v795_v12  ;;  %v2860_v28 = vpop.permute.xlu1 %255  ;;  %v2113_v63 = vpack.c.bf16 %v844_v62, %v843_v1 }
 0x37d   :  { %v593_v9 = vadd.f32 %v592_v4, %v2860_v28 }
 0x37e   :  { %v846_v53 = vmul.f32 %v2818_v7, %v838_v48  ;;  %v829_v29 = vsub.f32 2.0, %v821_v8  ;;  %2115 = vmatprep.subr.msk.bf16.mxu1 %vm2855_vm2, %v2113_v63 }
 0x37f   :  { %v2229_v24 = vpop.eup %2228  ;;  %2118 = vmatpush3.bf16.xpose.msk.msra.mxu1 %vm2855_vm2, %v2113_v63  ;;  %1956 = vmatprep.mubr.msk.f32.mxu1 %vm738_vm1, %v593_v9 }
 0x380   :  { %966 = vst.msk [vmem:[#allocation5 + $0x18] sm:$0xff] %vm738_vm1, %v846_v53  ;;  %v837_v33 = vmul.f32 %v2227_v20, %v829_v29  ;;  %v824_v37 = vmul.f32 %v2229_v24, %v804_v36 }
 0x381   :  { %v810_v12 = vpop.xlane.xlu0 %809 }
 0x382   :  { %v845_v16 = vmul.f32 %v2822_v3, %v837_v33  ;;  %v832_v4 = vsub.f32 2.0, %v824_v37  ;;  %2232 = vrcp.f32 %v810_v12  ;;  %v2889_v33 = vld [vmem:[%s3120_s0 + $0x10] sm:$0xff]  ;;  %v2894_v37 = vld [vmem:[%s3120_s0 + $0x18] sm:$0xff] }
 0x383   :  { %v2231_v7 = vpop.eup %2230 }
 0x384   :  { %965 = vst.msk [vmem:[#allocation5 + $0x10] sm:$0xff] %vm738_vm1, %v845_v16  ;;  %v840_v57 = vmul.f32 %v2229_v24, %v832_v4  ;;  %v823_v44 = vmul.f32 %v2231_v7, %v801_v52  ;;  %v2119_v62 = vpack.c.bf16 %v846_v53, %v845_v16  ;;  %v2137_v16 = vpack.c.bf16 %v2894_v37, %v2889_v33 }
 0x386   :  { %v848_v0 = vmul.f32 %v2826_v17, %v840_v57  ;;  %v831_v1 = vsub.f32 2.0, %v823_v44  ;;  %2121 = vmatprep.subr.msk.bf16.mxu1 %vm2855_vm2, %v2119_v62  ;;  %v3204_v44 = vld [vmem:[#allocation18_spill] sm:$0xff] }
 0x387   :  { %2124 = vmatpush3.bf16.xpose.msk.msra.mxu1 %vm2855_vm2, %v2119_v62 }
 0x388   :  { %968 = vst.msk [vmem:[#allocation5 + $0x28] sm:$0xff] %vm738_vm1, %v848_v0  ;;  %v839_v20 = vmul.f32 %v2231_v7, %v831_v1 }
 0x38a   :  { %v847_v3 = vmul.f32 %v2830_v13, %v839_v20  ;;  %v3205_v20 = vld [vmem:[#allocation21_spill] sm:$0xff] }
 0x38c   :  { %v2233_v36 = vpop.eup %2232  ;;  %967 = vst.msk [vmem:[#allocation5 + $0x20] sm:$0xff] %vm738_vm1, %v847_v3  ;;  %v2125_v48 = vpack.c.bf16 %v848_v0, %v847_v3 }
 0x38d   :  { %v826_v52 = vmul.f32 %v2233_v36, %v810_v12 }
 0x38e   :  { %2127 = vmatprep.subr.msk.bf16.mxu1 %vm2855_vm2, %v2125_v48 }
 0x38f   :  { %v834_v17 = vsub.f32 2.0, %v826_v52  ;;  %2130 = vmatpush3.bf16.xpose.msk.msra.mxu1 %vm2855_vm2, %v2125_v48  ;;  %v3206_v52 = vld [vmem:[#allocation20_spill] sm:$0xff] }
 0x391   :  { %v842_v8 = vmul.f32 %v2233_v36, %v834_v17 }
 0x393   :  { %v850_v63 = vmul.f32 %v2834_v56, %v842_v8 }
 0x395   :  { %970 = vst.msk [vmem:[#allocation5 + $0x38] sm:$0xff] %vm738_vm1, %v850_v63 }
 0x3ad   :  { %v807_v9 = vpop.xlane.xlu1 %806 }
 0x3ae   :  { %2234 = vrcp.f32 %v807_v9 }
 0x3b1   :  { %v2904_v4 = vpop.permute.xlu1 %260 }
 0x3b2   :  { %v598_v7 = vadd.f32 %v2841_v60, %v2904_v4 }
 0x3b8   :  { %v2235_v13 = vpop.eup %2234 }
 0x3b9   :  { %v825_v53 = vmul.f32 %v2235_v13, %v807_v9 }
 0x3bb   :  { %v833_v29 = vsub.f32 2.0, %v825_v53 }
 0x3bd   :  { %v841_v24 = vmul.f32 %v2235_v13, %v833_v29  ;;  %v3207_v13 = vld [vmem:[#allocation22_spill] sm:$0xff]  ;;  %v3208_v29 = vld [vmem:[#allocation29_spill] sm:$0xff] }
 0x3bf   :  { %v849_v56 = vmul.f32 %v2843_v61, %v841_v24 }
 0x3c1   :  { %969 = vst.msk [vmem:[#allocation5 + $0x30] sm:$0xff] %vm738_vm1, %v849_v56  ;;  %v2131_v12 = vpack.c.bf16 %v850_v63, %v849_v56 }
 0x3c3   :  { %2133 = vmatprep.subr.msk.bf16.mxu1 %vm2855_vm2, %v2131_v12 }
 0x3c4   :  { %2136 = vmatpush3.bf16.xpose.msk.msra.mxu1 %vm2855_vm2, %v2131_v12 }
 0x3c5   :  { %2138 = vmatprep.subr.bf16.mxu1 %v2137_v16 }
 0x3cb   :  { %1957 = vmatmul.mubr.msk.f32.vlgmr.msra.gmra.mrb[8].mxu1 %vm738_vm1, %v598_v7 }
 0x3cc   :  { %2140 = vmatpush3.bf16.msra.mxu1 %v2137_v16  ;;  %1963 = vmatprep.mubr.msk.f32.mxu1 %vm263_vm0, %v2364_v2  ;;  %v3194_v2 = vld [vmem:[#allocation11_spill] sm:$0xff] }
 0x3cf   :  { %1964 = vmatmul.mubr.msk.f32.vlgmr.msra.gmra.mrb[10].mxu1 %vm263_vm0, %v2373_v5  ;;  %v3195_v5 = vld [vmem:[#allocation12_spill] sm:$0xff] }
 0x3d0   :  { %1966 = vmatprep.mubr.msk.f32.mxu1 %vm263_vm0, %v2378_v6  ;;  %v3196_v6 = vld [vmem:[#allocation13_spill] sm:$0xff] }
 0x3d3   :  { %1967 = vmatmul.mubr.msk.f32.gmra.mrb[12].mxu1 %vm263_vm0, %v2396_v10  ;;  %v2980_v10 = vstv %s3123_s3  ;;  %s2317_s3 = smov [#allocation5]  }
 0x3d4   :  { %1969 = vmatprep.mubr.msk.f32.mxu1 %vm263_vm0, %v2401_v11  ;;  %s1596_s11 = sshll.u32 %s2317_s3, 4  ;;  %s1597_s11 = int_to_ptr.vmem [resolvable:$true] %s1596_s11 }
 0x3d5   :  { %s2268_s12 = scalar_lea.vmem %s1597_s11, 2048  ;;  %p2273_p1 = scmp.lt.s32.totalorder %s1597_s11, %s1597_s11 }
 0x3d6   :  { %p2269_p0 = scmp.ne.s32.totalorder %s1597_s11, %s2268_s12  ;;  %p2274_p2 = scmp.lt.s32.totalorder %s2268_s12, %s2268_s12 }
 0x3d7   :  { %1970 = vmatmul.mubr.msk.f32.gmra.mrb[14].mxu1 %vm263_vm0, %v2416_v14 }
 0x3d8   :  { %1972 = vmatprep.mubr.msk.f32.mxu1 %vm263_vm0, %v2421_v15  ;;  %p2275_p3 = por %p2274_p2, %p2273_p1 }
 0x3da   :  { %p2276_p4 = pnand %p2275_p3, %p2269_p0 }
 0x3db   :  { %1973 = vmatmul.mubr.msk.f32.gmra.mrb[16].mxu1 %vm263_vm0, %v2436_v18 }
 0x3dc   :  { %1975 = vmatprep.mubr.msk.f32.mxu1 %vm263_vm0, %v2441_v19  ;;  %v3197_v19 = vld [vmem:[#allocation10_spill] sm:$0xff] }
 0x3df   :  { %1976 = vmatmul.mubr.msk.f32.gmra.mrb[18].mxu1 %vm263_vm0, %v2456_v22 }
 0x3e0   :  { %1978 = vmatprep.mubr.msk.f32.mxu1 %vm263_vm0, %v2461_v23  ;;  %v3198_v23 = vld [vmem:[#allocation9_spill] sm:$0xff] }
 0x3e3   :  { %1979 = vmatmul.mubr.msk.f32.gmra.mrb[20].mxu1 %vm263_vm0, %v2476_v26 }
 0x3e4   :  { %1981 = vmatprep.mubr.msk.f32.mxu1 %vm263_vm0, %v2481_v27 }
 0x3e7   :  { %1982 = vmatmul.mubr.msk.f32.gmra.mrb[22].mxu1 %vm263_vm0, %v2496_v30 }
 0x3e8   :  { %1984 = vmatprep.mubr.msk.f32.mxu1 %vm263_vm0, %v2501_v31  ;;  %v3199_v31 = vld [vmem:[#allocation15_spill] sm:$0xff] }
 0x3eb   :  { %1985 = vmatmul.mubr.msk.f32.gmra.mrb[24].mxu1 %vm263_vm0, %v2516_v34 }
 0x3ec   :  { %1987 = vmatprep.mubr.msk.f32.mxu1 %vm263_vm0, %v2521_v35 }
 0x3ef   :  { %1988 = vmatmul.mubr.msk.f32.gmra.mrb[26].mxu1 %vm263_vm0, %v2536_v38 }
 0x3f0   :  { %1990 = vmatprep.mubr.msk.f32.mxu1 %vm263_vm0, %v2541_v39  ;;  %v3200_v39 = vld [vmem:[#allocation17_spill] sm:$0xff] }
 0x3f3   :  { %1991 = vmatmul.mubr.msk.f32.gmra.mrb[28].mxu1 %vm263_vm0, %v2556_v42 }
 0x3f4   :  { %1993 = vmatprep.mubr.msk.f32.mxu1 %vm263_vm0, %v2561_v43 }
 0x3f7   :  { %1994 = vmatmul.mubr.msk.f32.gmra.mrb[30].mxu1 %vm263_vm0, %v2576_v46 }
 0x3f8   :  { %1996 = vmatprep.mubr.msk.f32.mxu1 %vm263_vm0, %v2581_v47  ;;  %v3201_v47 = vld [vmem:[#allocation14_spill] sm:$0xff] }
 0x3fb   :  { %1997 = vmatmul.mubr.msk.f32.gmra.mrb[32].mxu1 %vm263_vm0, %v2596_v50 }
 0x3fc   :  { %1999 = vmatprep.mubr.msk.f32.mxu1 %vm263_vm0, %v2601_v51 }
 0x3ff   :  { %2000 = vmatmul.mubr.msk.f32.gmra.mrb[34].mxu1 %vm263_vm0, %v2616_v54 }
 0x400   :  { %2002 = vmatprep.mubr.msk.f32.mxu1 %vm263_vm0, %v2621_v55  ;;  %v3202_v55 = vld [vmem:[#allocation16_spill] sm:$0xff] }
 0x403   :  { %2003 = vmatmul.mubr.msk.f32.gmra.mrb[36].mxu1 %vm263_vm0, %v2636_v58 }
 0x404   :  { %2005 = vmatprep.mubr.msk.f32.mxu1 %vm263_vm0, %v2641_v59 }
 0x407   :  { %2006 = vmatmul.mubr.msk.f32.gmra.mrb[38].mxu1 %vm263_vm0, %v3194_v2 }
 0x408   :  { %2008 = vmatprep.mubr.msk.f32.mxu1 %vm263_vm0, %v3195_v5 }
 0x40b   :  { %2009 = vmatmul.mubr.msk.f32.gmra.mrb[40].mxu1 %vm263_vm0, %v3196_v6 }
 0x40c   :  { %2011 = vmatprep.mubr.msk.f32.mxu1 %vm263_vm0, %v2791_v21 }
 0x40f   :  { %2012 = vmatmul.mubr.msk.f32.gmra.mrb[42].mxu1 %vm263_vm0, %v2796_v41  ;;  %v3203_v41 = vld [vmem:[#allocation19_spill] sm:$0xff] }
 0x49e   :  { %v1958_v11 = vpop.f32.mrb[8].mxu1 }
 0x49f   :  { %v958_v14 = vmul.f32 %v1958_v11, %v2980_v10  ;;  %v947_v15 = vpop.f32.mrb[9].mxu1 }
 0x4a0   :  { %v957_v18 = vmul.f32 %v2980_v10, %v947_v15 }
 0x4a1   :  { %v960_v22 = vadd.f32 %v958_v14, %v3197_v19 }
 0x4a2   :  { %v959_v26 = vadd.f32 %v957_v18, %v3198_v23  ;;  %v1965_v27 = vpop.f32.mrb[10].mxu1  ;;  %v3210_v18 = vld [vmem:[#allocation24_spill] sm:$0xff] }
 0x4a3   :  { %962 = vst.msk [vmem:[#allocation3 + $0x8] sm:$0xff] %vm738_vm1, %v960_v22  ;;  %v1040_v30 = vpop.f32.mrb[11].mxu1  ;;  %v1046_v42 = vadd.f32 %v1965_v27, %v3200_v39  ;;  %v3211_v22 = vld [vmem:[#allocation31_spill] sm:$0xff] }
 0x4a4   :  { %961 = vst.msk [vmem:[#allocation3] sm:$0xff] %vm738_vm1, %v959_v26  ;;  %v1041_v34 = vadd.f32 %v1040_v30, %v3199_v31  ;;  %v3213_v30 = vld [vmem:[#allocation23_spill] sm:$0xff] }
 0x4a6   :  { %v1968_v35 = vpop.f32.mrb[12].mxu1  ;;  %1209 = vxpose.xlu1.b32.start [1/16] (narrow) %v1041_v34, 64  ;;  %v3214_v34 = vld [vmem:[#allocation33_spill] sm:$0xff] }
 0x4a7   :  { %v1050_v38 = vpop.f32.mrb[13].mxu1  ;;  %v1056_v58 = vadd.f32 %v1968_v35, %v3202_v55 }
 0x4a8   :  { %v1051_v50 = vadd.f32 %v1050_v38, %v3201_v47  ;;  %v3216_v47 = vld [vmem:[#allocation26_spill] sm:$0xff] }
 0x4aa   :  { %v1971_v43 = vpop.f32.mrb[14].mxu1  ;;  %1210 = vxpose.xlu1.b32.cont [2/16] (narrow) %v1046_v42, 64  ;;  %v3215_v42 = vld [vmem:[#allocation34_spill] sm:$0xff] }
 0x4ab   :  { %v1060_v46 = vpop.f32.mrb[15].mxu1  ;;  %v1066_v62 = vadd.f32 %v1971_v43, %v3204_v44 }
 0x4ac   :  { %v1061_v60 = vadd.f32 %v1060_v46, %v3203_v41 }
 0x4ae   :  { %v1974_v51 = vpop.f32.mrb[16].mxu1  ;;  %1211 = vxpose.xlu1.b32.cont [3/16] (narrow) %v1051_v50, 64 }
 0x4af   :  { %v1070_v54 = vpop.f32.mrb[17].mxu1  ;;  %v1076_v17 = vadd.f32 %v1974_v51, %v3206_v52  ;;  %v3217_v51 = vld [vmem:[#allocation35_spill] sm:$0xff] }
 0x4b0   :  { %v1071_v3 = vadd.f32 %v1070_v54, %v3205_v20 }
 0x4b2   :  { %v1977_v59 = vpop.f32.mrb[18].mxu1  ;;  %1212 = vxpose.xlu1.b32.cont [4/16] (narrow) %v1056_v58, 64 }
 0x4b3   :  { %v1080_v21 = vpop.f32.mrb[19].mxu1  ;;  %v1086_v2 = vadd.f32 %v1977_v59, %v2699_v25  ;;  %v3212_v25 = vld [vmem:[#allocation32_spill] sm:$0xff] }
 0x4b4   :  { %v1081_v53 = vadd.f32 %v1080_v21, %v3207_v13  ;;  %v3218_v59 = vld [vmem:[#allocation36_spill] sm:$0xff] }
 0x4b6   :  { %v1980_v61 = vpop.f32.mrb[20].mxu1  ;;  %1213 = vxpose.xlu1.b32.cont [5/16] (narrow) %v1061_v60, 64  ;;  %v3219_v60 = vld [vmem:[#allocation25_spill] sm:$0xff] }
 0x4b7   :  { %v1090_v57 = vpop.f32.mrb[21].mxu1  ;;  %v1096_v31 = vadd.f32 %v1980_v61, %v3213_v30 }
 0x4b8   :  { %v1091_v19 = vadd.f32 %v1090_v57, %v3210_v18  ;;  %v3220_v57 = vld [vmem:[#allocation37_spill] sm:$0xff] }
 0x4ba   :  { %v1983_v0 = vpop.f32.mrb[22].mxu1  ;;  %1214 = vxpose.xlu1.b32.cont [6/16] (narrow) %v1066_v62, 64 }
 0x4bb   :  { %v1100_v1 = vpop.f32.mrb[23].mxu1  ;;  %v1106_v61 = vadd.f32 %v1983_v0, %v3219_v60  ;;  %v3224_v0 = vld [vmem:[#allocation40_spill] sm:$0xff] }
 0x4bc   :  { %v1101_v50 = vadd.f32 %v1100_v1, %v3216_v47  ;;  %v3221_v1 = vld [vmem:[#allocation38_spill] sm:$0xff] }
 0x4be   :  { %v2995_v36 = vpop.f32.mrb[24].mxu1  ;;  %1215 = vxpose.xlu1.b32.cont [7/16] (narrow) %v1071_v3, 64 }
 0x4bf   :  { %v1110_v48 = vpop.f32.mrb[25].mxu1 }
 0x4c2   :  { %v1989_v8 = vpop.f32.mrb[26].mxu1  ;;  %1216 = vxpose.xlu1.b32.cont [8/16] (narrow) %v1076_v17, 64  ;;  %v3222_v17 = vld [vmem:[#allocation28_spill] sm:$0xff] }
 0x4c3   :  { %v1126_v63 = vadd.f32 %v1989_v8, %v2719_v32  ;;  %v1120_v9 = vpop.f32.mrb[27].mxu1  ;;  %v3209_v32 = vld [vmem:[#allocation30_spill] sm:$0xff]  ;;  %v1111_v8 = vadd.f32 %v1110_v48, %v3222_v17 }
 0x4c4   :  { %v1121_v24 = vadd.f32 %v1120_v9, %v3208_v29 }
 0x4c6   :  { %v2141_v56 = vpack.c.bf16 %v1126_v63, %v1121_v24  ;;  %v1992_v12 = vpop.f32.mrb[28].mxu1  ;;  %1217 = vxpose.xlu1.b32.cont [9/16] (narrow) %v1081_v53, 64  ;;  %v3223_v63 = vld [vmem:[#allocation39_spill] sm:$0xff] }
 0x4c7   :  { %v1136_v16 = vadd.f32 %v1992_v12, %v2725_v49  ;;  %v1130_v7 = vpop.f32.mrb[29].mxu1 }
 0x4c8   :  { %v1131_v5 = vadd.f32 %v1130_v7, %v2729_v40  ;;  %2142 = vmatprep.subr.bf16.mxu0 %v2141_v56 }
 0x4c9   :  { %2144 = vmatpush3.bf16.msra.mxu0 %v2141_v56  ;;  %v3225_v56 = vld [vmem:[#allocation27_spill] sm:$0xff] }
 0x4ca   :  { %v2145_v6 = vpack.c.bf16 %v1136_v16, %v1131_v5  ;;  %v1995_v11 = vpop.f32.mrb[30].mxu1  ;;  %1218 = vxpose.xlu1.b32.cont [10/16] (narrow) %v1086_v2, 64  ;;  %v1116_v12 = vadd.f32 %v2995_v36, %v3225_v56  ;;  %v3226_v16 = vld [vmem:[#allocation41_spill] sm:$0xff] }
 0x4cb   :  { %v1146_v14 = vadd.f32 %v1995_v11, %v3209_v32  ;;  %v1140_v15 = vpop.f32.mrb[31].mxu1 }
 0x4cc   :  { %v1141_v23 = vadd.f32 %v1140_v15, %v3211_v22  ;;  %2146 = vmatprep.subr.bf16.mxu0 %v2145_v6 }
 0x4cd   :  { %2148 = vmatpush3.bf16.msra.mxu0 %v2145_v6 }
 0x4ce   :  { %v2149_v49 = vpack.c.bf16 %v1146_v14, %v1141_v23  ;;  %v1998_v26 = vpop.f32.mrb[32].mxu1  ;;  %1219 = vxpose.xlu1.b32.cont [11/16] (narrow) %v1091_v19, 64 }
 0x4cf   :  { %v1156_v27 = vadd.f32 %v1998_v26, %v3212_v25  ;;  %v1150_v40 = vpop.f32.mrb[33].mxu1 }
 0x4d0   :  { %v1151_v35 = vadd.f32 %v1150_v40, %v3214_v34  ;;  %2150 = vmatprep.subr.bf16.mxu0 %v2149_v49 }
 0x4d1   :  { %2152 = vmatpush3.bf16.msra.mxu0 %v2149_v49 }
 0x4d2   :  { %v2153_v38 = vpack.c.bf16 %v1156_v27, %v1151_v35  ;;  %v2001_v39 = vpop.f32.mrb[34].mxu1  ;;  %1220 = vxpose.xlu1.b32.cont [12/16] (narrow) %v1096_v31, 64 }
 0x4d3   :  { %v1166_v43 = vadd.f32 %v2001_v39, %v3215_v42  ;;  %v1160_v46 = vpop.f32.mrb[35].mxu1 }
 0x4d4   :  { %v1161_v54 = vadd.f32 %v1160_v46, %v3217_v51  ;;  %2154 = vmatprep.subr.bf16.mxu0 %v2153_v38 }
 0x4d5   :  { %2156 = vmatpush3.bf16.msra.mxu0 %v2153_v38 }
 0x4d6   :  { %v2157_v55 = vpack.c.bf16 %v1166_v43, %v1161_v54  ;;  %v2004_v58 = vpop.f32.mrb[36].mxu1  ;;  %1221 = vxpose.xlu1.b32.cont [13/16] (narrow) %v1101_v50, 64 }
 0x4d7   :  { %v1176_v21 = vadd.f32 %v2004_v58, %v3218_v59  ;;  %v1170_v41 = vpop.f32.mrb[37].mxu1 }
 0x4d8   :  { %v1171_v44 = vadd.f32 %v1170_v41, %v3220_v57  ;;  %2158 = vmatprep.subr.bf16.mxu0 %v2157_v55 }
 0x4d9   :  { %2160 = vmatpush3.bf16.msra.mxu0 %v2157_v55 }
 0x4da   :  { %v2161_v62 = vpack.c.bf16 %v1176_v21, %v1171_v44  ;;  %v2007_v20 = vpop.f32.mrb[38].mxu1  ;;  %1222 = vxpose.xlu1.b32.cont [14/16] (narrow) %v1106_v61, 64 }
 0x4db   :  { %v1186_v3 = vadd.f32 %v2007_v20, %v3221_v1  ;;  %v1180_v52 = vpop.f32.mrb[39].mxu1 }
 0x4dc   :  { %v1181_v9 = vadd.f32 %v1180_v52, %v3223_v63  ;;  %2162 = vmatprep.subr.bf16.mxu0 %v2161_v62 }
 0x4dd   :  { %2164 = vmatpush3.bf16.msra.mxu0 %v2161_v62 }
 0x4de   :  { %v2165_v13 = vpack.c.bf16 %v1186_v3, %v1181_v9  ;;  %v2010_v53 = vpop.f32.mrb[40].mxu1  ;;  %1223 = vxpose.xlu1.b32.cont [15/16] (narrow) %v1111_v8, 64 }
 0x4df   :  { %v1196_v29 = vadd.f32 %v2010_v53, %v3224_v0  ;;  %v1190_v24 = vpop.f32.mrb[41].mxu1 }
 0x4e0   :  { %v1191_v7 = vadd.f32 %v1190_v24, %v3226_v16  ;;  %2166 = vmatprep.subr.bf16.mxu0 %v2165_v13 }
 0x4e1   :  { %2168 = vmatpush3.bf16.msra.mxu0 %v2165_v13 }
 0x4e2   :  { %v2169_v2 = vpack.c.bf16 %v1196_v29, %v1191_v7  ;;  %v3023_v5 = vpop.f32.mrb[42].mxu1  ;;  %1224 = vxpose.xlu1.b32.end [16/16] (narrow) %v1116_v12, 64 }
 0x4e3   :  { %v1200_v48 = vpop.f32.mrb[43].mxu1 }
 0x4e4   :  { %2170 = vmatprep.subr.bf16.mxu0 %v2169_v2  ;;  %v1201_v19 = vadd.f32 %v1200_v48, %v2860_v28 }
 0x4e5   :  { %2172 = vmatpush3.bf16.msra.mxu0 %v2169_v2 }
 0x526   :  { %v1225_v6 = vpop.trf.xlu1 }
 0x527   :  { %2046 = vmatprep.mubr.f32.mxu0 %v1225_v6 }
 0x52a   :  { %v1226_v11 = vpop.trf.xlu1 }
 0x52b   :  { %2047 = vmatmul.mubr.f32.vlgmr.msra.gmra.mrb[34].mxu0 %v1226_v11 }
 0x52e   :  { %v1227_v32 = vpop.trf.xlu1 }
 0x52f   :  { %2049 = vmatprep.mubr.f32.mxu0 %v1227_v32 }
 0x532   :  { %v1228_v14 = vpop.trf.xlu1 }
 0x533   :  { %2050 = vmatmul.mubr.f32.gmra.mrb[36].mxu0 %v1228_v14 }
 0x536   :  { %v1229_v36 = vpop.trf.xlu1 }
 0x537   :  { %2052 = vmatprep.mubr.f32.mxu0 %v1229_v36 }
 0x53a   :  { %v1230_v15 = vpop.trf.xlu1 }
 0x53b   :  { %2053 = vmatmul.mubr.f32.gmra.mrb[38].mxu0 %v1230_v15 }
 0x53e   :  { %v1231_v18 = vpop.trf.xlu1 }
 0x53f   :  { %2055 = vmatprep.mubr.f32.mxu0 %v1231_v18 }
 0x542   :  { %v1232_v22 = vpop.trf.xlu1 }
 0x543   :  { %2056 = vmatmul.mubr.f32.gmra.mrb[40].mxu0 %v1232_v22 }
 0x544   :  { %2074 = vmatprep.mubr.msk.f32.mxu0 %vm738_vm1, %v1201_v19 }
 0x5fe   :  { %v2048_v23 = vpop.f32.mrb[34].mxu0 }
 0x5ff   :  { %v1307_v49 = vpop.f32.mrb[35].mxu0  ;;  %v1349_v26 = vsel %vm738_vm1, %v2048_v23, -inf }
 0x600   :  { %1350 = vmax.xlane.f32.xlu0 %v1349_v26  ;;  %v1346_v25 = vsel %vm738_vm1, %v1307_v49, -inf }
 0x604   :  { %1347 = vmax.xlane.f32.xlu0 %v1346_v25 }
 0x606   :  { %v2051_v27 = vpop.f32.mrb[36].mxu0 }
 0x607   :  { %v1317_v40 = vpop.f32.mrb[37].mxu0  ;;  %v1355_v30 = vsel %vm738_vm1, %v2051_v27, -inf }
 0x608   :  { %1356 = vmax.xlane.f32.xlu0 %v1355_v30  ;;  %v1352_v31 = vsel %vm738_vm1, %v1317_v40, -inf }
 0x60c   :  { %1353 = vmax.xlane.f32.xlu0 %v1352_v31 }
 0x60e   :  { %v2054_v28 = vpop.f32.mrb[38].mxu0 }
 0x60f   :  { %v1327_v34 = vpop.f32.mrb[39].mxu0  ;;  %v1361_v35 = vsel %vm738_vm1, %v2054_v28, -inf }
 0x610   :  { %1362 = vmax.xlane.f32.xlu0 %v1361_v35  ;;  %v1358_v38 = vsel %vm738_vm1, %v1327_v34, -inf }
 0x614   :  { %1359 = vmax.xlane.f32.xlu0 %v1358_v38 }
 0x616   :  { %v2057_v39 = vpop.f32.mrb[40].mxu0 }
 0x617   :  { %v1337_v42 = vpop.f32.mrb[41].mxu0  ;;  %v1367_v46 = vsel %vm738_vm1, %v2057_v39, -inf }
 0x618   :  { %v1364_v43 = vsel %vm738_vm1, %v1337_v42, -inf }
 0x619   :  { %1365 = vmax.xlane.f32.xlu0 %v1364_v43 }
 0x61d   :  { %1368 = vmax.xlane.f32.xlu0 %v1367_v46 }
 0x68d   :  { %v1351_v47 = vpop.xlane.xlu0 %1350 }
 0x68e   :  { %v1371_v50 = vsub.f32 %v2048_v23, %v1351_v47 }
 0x690   :  { %v1380_v51 = vmul.f32 1.442695, %v1371_v50 }
 0x691   :  { %v1348_v54 = vpop.xlane.xlu0 %1347 }
 0x692   :  { %2236 = vpow2.f32 %v1380_v51  ;;  %v1370_v55 = vsub.f32 %v1307_v49, %v1348_v54 }
 0x694   :  { %v1378_v58 = vmul.f32 1.442695, %v1370_v55 }
 0x695   :  { %v1357_v59 = vpop.xlane.xlu0 %1356 }
 0x696   :  { %2238 = vpow2.f32 %v1378_v58  ;;  %v1373_v21 = vsub.f32 %v2051_v27, %v1357_v59 }
 0x698   :  { %v1384_v41 = vmul.f32 1.442695, %v1373_v21 }
 0x699   :  { %v1354_v60 = vpop.xlane.xlu0 %1353 }
 0x69a   :  { %2240 = vpow2.f32 %v1384_v41  ;;  %v1372_v61 = vsub.f32 %v1317_v40, %v1354_v60 }
 0x69c   :  { %v2237_v57 = vpop.eup %2236  ;;  %v1382_v44 = vmul.f32 1.442695, %v1372_v61 }
 0x69d   :  { %v1363_v62 = vpop.xlane.xlu0 %1362  ;;  %v1397_v20 = vsel %vm738_vm1, %v2237_v57, 0.0 }
 0x69e   :  { %2242 = vpow2.f32 %v1382_v44  ;;  %v1375_v1 = vsub.f32 %v2054_v28, %v1363_v62  ;;  %1398 = vadd.xlane.f32.xlu0 %v1397_v20 }
 0x6a0   :  { %v2239_v3 = vpop.eup %2238  ;;  %v1388_v52 = vmul.f32 1.442695, %v1375_v1 }
 0x6a1   :  { %v1360_v17 = vpop.xlane.xlu0 %1359  ;;  %v1394_v8 = vsel %vm738_vm1, %v2239_v3, 0.0 }
 0x6a2   :  { %2244 = vpow2.f32 %v1388_v52  ;;  %v1374_v63 = vsub.f32 %v1327_v34, %v1360_v17  ;;  %1395 = vadd.xlane.f32.xlu0 %v1394_v8 }
 0x6a4   :  { %v2241_v9 = vpop.eup %2240  ;;  %v1386_v13 = vmul.f32 1.442695, %v1374_v63 }
 0x6a5   :  { %v1403_v53 = vsel %vm738_vm1, %v2241_v9, 0.0 }
 0x6a6   :  { %2246 = vpow2.f32 %v1386_v13  ;;  %1404 = vadd.xlane.f32.xlu0 %v1403_v53  ;;  %v1366_v0 = vpop.xlane.xlu0 %1365 }
 0x6a7   :  { %v1376_v29 = vsub.f32 %v1337_v42, %v1366_v0 }
 0x6a8   :  { %v3038_v24 = vpop.eup %2242 }
 0x6a9   :  { %v1390_v56 = vmul.f32 1.442695, %v1376_v29  ;;  %v1400_v12 = vsel %vm738_vm1, %v3038_v24, 0.0 }
 0x6aa   :  { %1401 = vadd.xlane.f32.xlu0 %v1400_v12  ;;  %v1369_v16 = vpop.xlane.xlu0 %1368 }
 0x6ab   :  { %2248 = vpow2.f32 %v1390_v56  ;;  %v1377_v7 = vsub.f32 %v2057_v39, %v1369_v16 }
 0x6ac   :  { %v3042_v2 = vpop.eup %2244 }
 0x6ad   :  { %v1392_v48 = vmul.f32 1.442695, %v1377_v7  ;;  %v1409_v6 = vsel %vm738_vm1, %v3042_v2, 0.0 }
 0x6ae   :  { %1410 = vadd.xlane.f32.xlu0 %v1409_v6 }
 0x6af   :  { %2250 = vpow2.f32 %v1392_v48 }
 0x6b0   :  { %v3046_v11 = vpop.eup %2246 }
 0x6b1   :  { %v1406_v32 = vsel %vm738_vm1, %v3046_v11, 0.0 }
 0x6b2   :  { %1407 = vadd.xlane.f32.xlu0 %v1406_v32 }
 0x6b5   :  { %v3050_v14 = vpop.eup %2248 }
 0x6b6   :  { %v1412_v36 = vsel %vm738_vm1, %v3050_v14, 0.0 }
 0x6b7   :  { %1413 = vadd.xlane.f32.xlu0 %v1412_v36 }
 0x6b9   :  { %v3054_v15 = vpop.eup %2250 }
 0x6ba   :  { %v1415_v18 = vsel %vm738_vm1, %v3054_v15, 0.0 }
 0x6bb   :  { %1416 = vadd.xlane.f32.xlu0 %v1415_v18 }
 0x72b   :  { %v1399_v19 = vpop.xlane.xlu0 %1398 }
 0x72c   :  { %2252 = vrcp.f32 %v1399_v19 }
 0x72f   :  { %v1396_v22 = vpop.xlane.xlu0 %1395 }
 0x730   :  { %2254 = vrcp.f32 %v1396_v22 }
 0x733   :  { %v1405_v23 = vpop.xlane.xlu0 %1404 }
 0x734   :  { %2256 = vrcp.f32 %v1405_v23 }
 0x736   :  { %v2253_v49 = vpop.eup %2252 }
 0x737   :  { %v1427_v26 = vmul.f32 %v2253_v49, %v1399_v19  ;;  %v1402_v25 = vpop.xlane.xlu0 %1401 }
 0x738   :  { %2258 = vrcp.f32 %v1402_v25 }
 0x739   :  { %v1435_v27 = vsub.f32 2.0, %v1427_v26 }
 0x73a   :  { %v2255_v40 = vpop.eup %2254 }
 0x73b   :  { %v1443_v30 = vmul.f32 %v2253_v49, %v1435_v27  ;;  %v1426_v31 = vmul.f32 %v2255_v40, %v1396_v22  ;;  %v1411_v28 = vpop.xlane.xlu0 %1410 }
 0x73c   :  { %2260 = vrcp.f32 %v1411_v28 }
 0x73d   :  { %v1451_v34 = vmul.f32 %v2237_v57, %v1443_v30  ;;  %v1434_v35 = vsub.f32 2.0, %v1426_v31 }
 0x73e   :  { %v2257_v38 = vpop.eup %2256 }
 0x73f   :  { %1572 = vst.msk [vmem:[#allocation5 + $0x48] sm:$0xff] %vm738_vm1, %v1451_v34  ;;  %v1442_v39 = vmul.f32 %v2255_v40, %v1434_v35  ;;  %v1429_v42 = vmul.f32 %v2257_v38, %v1405_v23  ;;  %v1408_v43 = vpop.xlane.xlu0 %1407 }
 0x740   :  { %2262 = vrcp.f32 %v1408_v43 }
 0x741   :  { %v1450_v46 = vmul.f32 %v2239_v3, %v1442_v39  ;;  %v1437_v47 = vsub.f32 2.0, %v1429_v42 }
 0x742   :  { %v2259_v50 = vpop.eup %2258 }
 0x743   :  { %1571 = vst.msk [vmem:[#allocation5 + $0x40] sm:$0xff] %vm738_vm1, %v1450_v46  ;;  %v1445_v51 = vmul.f32 %v2257_v38, %v1437_v47  ;;  %v1428_v54 = vmul.f32 %v2259_v50, %v1402_v25  ;;  %v2173_v55 = vpack.c.bf16 %v1451_v34, %v1450_v46 }
 0x744   :  { %v1414_v58 = vpop.xlane.xlu0 %1413 }
 0x745   :  { %v1453_v59 = vmul.f32 %v2241_v9, %v1445_v51  ;;  %v1436_v21 = vsub.f32 2.0, %v1428_v54  ;;  %2264 = vrcp.f32 %v1414_v58  ;;  %2175 = vmatprep.subr.msk.bf16.mxu0 %vm2855_vm2, %v2173_v55 }
 0x746   :  { %v2261_v41 = vpop.eup %2260  ;;  %2178 = vmatpush3.bf16.xpose.msk.msra.mxu0 %vm2855_vm2, %v2173_v55 }
 0x747   :  { %1574 = vst.msk [vmem:[#allocation5 + $0x58] sm:$0xff] %vm738_vm1, %v1453_v59  ;;  %v1444_v60 = vmul.f32 %v2259_v50, %v1436_v21  ;;  %v1431_v61 = vmul.f32 %v2261_v41, %v1411_v28 }
 0x748   :  { %v1417_v57 = vpop.xlane.xlu0 %1416 }
 0x749   :  { %v1452_v44 = vmul.f32 %v3038_v24, %v1444_v60  ;;  %v1439_v62 = vsub.f32 2.0, %v1431_v61  ;;  %2266 = vrcp.f32 %v1417_v57 }
 0x74a   :  { %v2263_v20 = vpop.eup %2262 }
 0x74b   :  { %1573 = vst.msk [vmem:[#allocation5 + $0x50] sm:$0xff] %vm738_vm1, %v1452_v44  ;;  %v1447_v1 = vmul.f32 %v2261_v41, %v1439_v62  ;;  %v1430_v3 = vmul.f32 %v2263_v20, %v1408_v43  ;;  %v2179_v52 = vpack.c.bf16 %v1453_v59, %v1452_v44 }
 0x74d   :  { %v1455_v17 = vmul.f32 %v3042_v2, %v1447_v1  ;;  %v1438_v8 = vsub.f32 2.0, %v1430_v3  ;;  %2181 = vmatprep.subr.msk.bf16.mxu0 %vm2855_vm2, %v2179_v52 }
 0x74e   :  { %2184 = vmatpush3.bf16.xpose.msk.msra.mxu0 %vm2855_vm2, %v2179_v52 }
 0x74f   :  { %v2265_v63 = vpop.eup %2264  ;;  %1576 = vst.msk [vmem:[#allocation5 + $0x68] sm:$0xff] %vm738_vm1, %v1455_v17  ;;  %v1446_v9 = vmul.f32 %v2263_v20, %v1438_v8 }
 0x750   :  { %v1432_v13 = vmul.f32 %v2265_v63, %v1414_v58 }
 0x751   :  { %v1454_v53 = vmul.f32 %v3046_v11, %v1446_v9  ;;  %v1206_v11 = vadd.f32 %v3023_v5, %v2904_v4 }
 0x752   :  { %v1440_v0 = vsub.f32 2.0, %v1432_v13 }
 0x753   :  { %v2267_v29 = vpop.eup %2266  ;;  %1575 = vst.msk [vmem:[#allocation5 + $0x60] sm:$0xff] %vm738_vm1, %v1454_v53  ;;  %v2185_v24 = vpack.c.bf16 %v1455_v17, %v1454_v53 }
 0x754   :  { %v1448_v56 = vmul.f32 %v2265_v63, %v1440_v0  ;;  %v1433_v12 = vmul.f32 %v2267_v29, %v1417_v57 }
 0x755   :  { %2187 = vmatprep.subr.msk.bf16.mxu0 %vm2855_vm2, %v2185_v24 }
 0x756   :  { %v1456_v16 = vmul.f32 %v3050_v14, %v1448_v56  ;;  %v1441_v7 = vsub.f32 2.0, %v1433_v12  ;;  %2190 = vmatpush3.bf16.xpose.msk.msra.mxu0 %vm2855_vm2, %v2185_v24 }
 0x758   :  { %1577 = vst.msk [vmem:[#allocation5 + $0x70] sm:$0xff] %vm738_vm1, %v1456_v16  ;;  %v1449_v2 = vmul.f32 %v2267_v29, %v1441_v7 }
 0x75a   :  { %v1457_v48 = vmul.f32 %v3054_v15, %v1449_v2 }
 0x75c   :  { %v2191_v6 = vpack.c.bf16 %v1457_v48, %v1456_v16  ;;  %1578 = vst.msk [vmem:[#allocation5 + $0x78] sm:$0xff] %vm738_vm1, %v1457_v48 }
 0x75e   :  { %2193 = vmatprep.subr.msk.bf16.mxu0 %vm2855_vm2, %v2191_v6 }
 0x75f   :  { %2196 = vmatpush3.bf16.xpose.msk.msra.mxu0 %vm2855_vm2, %v2191_v6 }
 0x766   :  { %2075 = vmatmul.mubr.msk.f32.vlgmr.msra.gmra.mrb[42].mxu0 %vm738_vm1, %v1206_v11 }
 0x767   :  { %2279 = shalt.err (!%p2276_p4)
}
 0x768   :  { %s2280_s15 = scalar_lea.hbm %s3125_s5, 2048 }
 0x769   :  { %p2281_p5 = scmp.ne.s32.totalorder %s3125_s5, %s2280_s15  ;;  %p2284_p6 = scmp.lt.u32.totalorder %s2280_s15, %s3125_s5 }
 0x76b   :  { %p2286_p7 = pnand %p2284_p6, %p2281_p5 }
 0x76d   :  { %2289 = shalt.err (!%p2286_p7)
}
 0x76e   :  { %s2318_s20 = smov 128   ;;  %s2319_s21 = smov 8  }
 0x76f   :  { %1602 = dma.vmem_to_hbm [thread:$0]  %s1597_s11, 2048, %s3125_s5, [#allocation6], %s2318_s20, %s2318_s20, %s2319_s21  }
 0x770   :  { %s2320_s24 = smov [#allocation3]  }
 0x771   :  { %s1584_s25 = sshll.u32 %s2320_s24, 4  ;;  %s1585_s25 = int_to_ptr.vmem [resolvable:$true] %s1584_s25 }
 0x772   :  { %s2290_s26 = scalar_lea.vmem %s1585_s25, 512  ;;  %p2295_p9 = scmp.lt.s32.totalorder %s1585_s25, %s1585_s25 }
 0x773   :  { %p2291_p8 = scmp.ne.s32.totalorder %s1585_s25, %s2290_s26  ;;  %p2296_p10 = scmp.lt.s32.totalorder %s2290_s26, %s2290_s26 }
 0x775   :  { %p2297_p11 = por %p2296_p10, %p2295_p9 }
 0x777   :  { %p2298_p12 = pnand %p2297_p11, %p2291_p8 }
 0x839   :  { %v2076_v45 = vpop.f32.mrb[42].mxu0 }
 0x83a   :  { %v1564_v4 = vmul.f32 %v2076_v45, %v2980_v10  ;;  %v1554_v5 = vpop.f32.mrb[43].mxu0 }
 0x83b   :  { %v1563_v32 = vmul.f32 %v1554_v5, %v2980_v10 }
 0x83c   :  { %v1566_v14 = vadd.f32 %v2894_v37, %v1564_v4 }
 0x83d   :  { %v1565_v36 = vadd.f32 %v2889_v33, %v1563_v32 }
 0x83e   :  { %1569 = vst.msk [vmem:[#allocation3 + $0x18] sm:$0xff] %vm738_vm1, %v1566_v14 }
 0x83f   :  { %1568 = vst.msk [vmem:[#allocation3 + $0x10] sm:$0xff] %vm738_vm1, %v1565_v36 }
 0x840   :  { %2301 = shalt.err (!%p2298_p12)
}
 0x841   :  { %s2302_s28 = scalar_lea.hbm %s3124_s4, 512 }
 0x842   :  { %p2303_p13 = scmp.ne.s32.totalorder %s3124_s4, %s2302_s28  ;;  %p2306_p0 = scmp.lt.u32.totalorder %s2302_s28, %s3124_s4 }
 0x844   :  { %p2308_p1 = pnand %p2306_p0, %p2303_p13 }
 0x846   :  { %2311 = shalt.err (!%p2308_p1)
}
 0x847   :  { %1590 = dma.vmem_to_hbm [thread:$0]  %s1585_s25, 512, %s3124_s4, [#allocation4], %s2318_s20, %s2318_s20, %s2319_s21  }
 0x848   :  { %2312 = dma.done.wait [#allocation4], 512  }
 0x849   :  { %2313 = vsyncadd [#allocation4], 4294966784 }
 0x84a   :  { %2314 = dma.done.wait [#allocation6], 2048  }
 0x84b   :  { %2315 = vsyncadd [#allocation6], 4294965248 }
 0x84c   :  { %1609 = vsyncpa [#allocation4], 1 }
 0x84d   :  { %1610 = vsyncpa [#allocation6], 1 }

</bundles_post_ra>
